<compile_context>
chip_gen: v6e
topology: v6e:2x2x1
jax: 0.10.0
libtpu: 0.0.40
codegen_flags: <defaults>
</compile_context>

<pallas_src>
import math
from functools import partial

import jax
import jax.numpy as jnp
import numpy as np
from jax.experimental import pallas as pl
from jax.experimental.pallas import tpu as pltpu

_LANE = 128          # vreg lane width; loss-partial slabs are (1, 8, 128)
_LANE_ALIGN = 256    # pad D to 256: v6e/v7x MXUs are 2x256x256 (free zeros on v5e)


def _round_up(x, m):
    return (x + m - 1) // m * m


def _vmem_budget():
    """~75% of this generation's VMEM capacity (fallback: v7x-safe 48 MiB)."""
    try:
        cap = int(pltpu.get_tpu_info().vmem_capacity_bytes)
    except Exception:  # pragma: no cover - query unavailable
        cap = 64 << 20
    return int(cap * 3 // 4)


def _single_buffered_spec(shape, index_map):
    # Constant index_map -> single-buffer the resident weight (halves its VMEM
    # footprint); gracefully fall back if this JAX version lacks pipeline_mode.
    try:
        return pl.BlockSpec(shape, index_map, pipeline_mode=pl.Buffered(1))
    except TypeError:  # pragma: no cover - older JAX
        return pl.BlockSpec(shape, index_map)


# ----------------------------- kernel bodies -------------------------------- #

def _resident_loss_kernel(h_ref, wr_ref, wa_ref, out_ref, loss_ref):
    """Stage-1 resident path: one (tm, Dp) row tile, both weights in VMEM."""
    h = h_ref[...]
    ret = jnp.dot(h, wr_ref[...], preferred_element_type=jnp.float32)   # teacher
    aux = jnp.dot(h, wa_ref[...], preferred_element_type=jnp.float32)   # student
    out_ref[...] = ret.astype(out_ref.dtype)

    # sum over rows of ||ret - aux||_2 ; padded rows/lanes are zero -> no effect.
    diff = ret - aux
    row_sq = jnp.sum(diff * diff, axis=-1, keepdims=True)               # (tm, 1)
    tile_loss = jnp.sum(jnp.sqrt(row_sq))
    loss_ref[...] = jnp.full((1, 8, _LANE), tile_loss, dtype=jnp.float32)


def _resident_proj_kernel(h_ref, wr_ref, out_ref):
    """Stage != 1 resident path: projection only (no aux matmul, no loss)."""
    out_ref[...] = jnp.dot(h_ref[...], wr_ref[...],
                           preferred_element_type=jnp.float32).astype(out_ref.dtype)


def _ktiled_loss_kernel(h_ref, wr_ref, wa_ref, out_ref, loss_ref,
                        acc_r_ref, acc_a_ref):
    """Stage-1 K-tiled path: grid=(row tiles, K blocks), f32 VMEM accumulators."""
    k = pl.program_id(1)

    @pl.when(k == 0)
    def _():
        acc_r_ref[...] = jnp.zeros_like(acc_r_ref)
        acc_a_ref[...] = jnp.zeros_like(acc_a_ref)

    h = h_ref[...]
    acc_r_ref[...] += jnp.dot(h, wr_ref[...], preferred_element_type=jnp.float32)
    acc_a_ref[...] += jnp.dot(h, wa_ref[...], preferred_element_type=jnp.float32)

    @pl.when(k == pl.num_programs(1) - 1)
    def _():
        ret = acc_r_ref[...]
        aux = acc_a_ref[...]
        out_ref[...] = ret.astype(out_ref.dtype)
        diff = ret - aux
        row_sq = jnp.sum(diff * diff, axis=-1, keepdims=True)
        loss_ref[...] = jnp.full((1, 8, _LANE), jnp.sum(jnp.sqrt(row_sq)),
                                 dtype=jnp.float32)


def _ktiled_proj_kernel(h_ref, wr_ref, out_ref, acc_r_ref):
    """Stage != 1 K-tiled path: projection only."""
    k = pl.program_id(1)

    @pl.when(k == 0)
    def _():
        acc_r_ref[...] = jnp.zeros_like(acc_r_ref)

    acc_r_ref[...] += jnp.dot(h_ref[...], wr_ref[...],
                              preferred_element_type=jnp.float32)

    @pl.when(k == pl.num_programs(1) - 1)
    def _():
        out_ref[...] = acc_r_ref[...].astype(out_ref.dtype)


# ----------------------------- host wrapper --------------------------------- #

def _pad_weight(w, Dp):
    """Cast to bf16 and zero-pad a (D, D) weight to (Dp, Dp).  Cache the result."""
    D = w.shape[0]
    w = w.astype(jnp.bfloat16)
    if D != Dp:
        w = jnp.pad(w, ((0, Dp - D), (0, Dp - D)))
    return w


def attention_wrapper_pallas(hidden_states, w_return_p, w_aux_p=None, *,
                             out_dtype=None, tm=None, tk=None,
                             force_k_tiled=False):
    """Projection (+ optional distillation-loss partials) kernel dispatcher.

    hidden_states : [B, T, D]
    w_return_p    : (Dp, Dp) bf16 pre-padded weight of the returned projection
    w_aux_p       : (Dp, Dp) bf16 pre-padded weight of the loss-only projection,
                    or None to skip the aux matmul + loss entirely (stage != 1).
    Returns (projection [B, T, D], loss_sum or None) where loss_sum is the sum
    over tokens of ||ret_row - aux_row||_2 (f32-accumulator precision).
    """
    B, T, D = hidden_states.shape
    M = B * T
    Dp = w_return_p.shape[0]
    compute_loss = w_aux_p is not None
    out_dtype = hidden_states.dtype if out_dtype is None else out_dtype
    out_isize = jnp.dtype(out_dtype).itemsize
    n_w = 2 if compute_loss else 1

    if tm is None:
        # Big row tiles amortize the ~0.35us/grid-step overhead at small D;
        # smaller tiles bound the f32 temporaries at large D.
        tm = 512 if Dp <= 512 else 256

    budget = _vmem_budget()
    loss_bytes = 2 * 8 * _LANE * 4 if compute_loss else 0

    def _resident_bytes(tm_):
        return (n_w * Dp * Dp * 2            # single-buffered bf16 weights
                + 2 * tm_ * Dp * 2           # h tile, double-buffered
                + 2 * tm_ * Dp * out_isize   # out tile, double-buffered
                + loss_bytes
                + (n_w + 1) * tm_ * Dp * 4   # f32 ret/aux/diff temporaries
                + (2 << 20))                 # Mosaic internal scratch slack

    use_k_tiled = force_k_tiled or _resident_bytes(tm) > budget

    if use_k_tiled:
        if tk is None:
            tk = 512 if Dp % 512 == 0 else 256
        tk = min(tk, Dp)

        def _ktiled_bytes(tm_, tk_):
            return (2 * n_w * tk_ * Dp * 2       # weight K-blocks, double-buffered
                    + 2 * tm_ * tk_ * 2          # h K-blocks, double-buffered
                    + 2 * tm_ * Dp * out_isize   # out tile, double-buffered
                    + n_w * tm_ * Dp * 4         # f32 accumulator scratch
                    + loss_bytes
                    + (n_w + 1) * tm_ * Dp * 4   # epilogue f32 temporaries
                    + (2 << 20))

        while _ktiled_bytes(tm, tk) > budget and tk > 128:
            tk //= 2
        while _ktiled_bytes(tm, tk) > budget and tm > 128:
            tm //= 2
        # TODO(synk): for extreme D where even (tm=128, tk=128) exceeds the
        # budget, the output N axis would also need a grid dimension.
        vmem_limit = int(min(max(_ktiled_bytes(tm, tk), 8 << 20), budget))
        n_k = Dp // tk
    else:
        vmem_limit = int(min(max(_resident_bytes(tm), 8 << 20), budget))

    Mp = _round_up(M, tm)
    n_tiles = Mp // tm

    # Lane-dense, tile-aligned zero padding (skipped entirely when aligned).
    h2d = hidden_states.reshape(M, D).astype(jnp.bfloat16)
    if (Mp, Dp) != (M, D):
        h2d = jnp.pad(h2d, ((0, Mp - M), (0, Dp - D)))

    if not use_k_tiled:
        # -------- resident-weight path: 1-D "parallel" row grid ------------- #
        if compute_loss:
            out_pad, loss_tiles = pl.pallas_call(
                _resident_loss_kernel,
                out_shape=(
                    jax.ShapeDtypeStruct((Mp, Dp), out_dtype),
                    jax.ShapeDtypeStruct((n_tiles, 8, _LANE), jnp.float32),
                ),
                grid_spec=pltpu.PrefetchScalarGridSpec(
                    num_scalar_prefetch=0,
                    grid=(n_tiles,),
                    in_specs=[
                        pl.BlockSpec((tm, Dp), lambda i: (i, 0)),
                        _single_buffered_spec((Dp, Dp), lambda i: (0, 0)),
                        _single_buffered_spec((Dp, Dp), lambda i: (0, 0)),
                    ],
                    out_specs=[
                        pl.BlockSpec((tm, Dp), lambda i: (i, 0)),
                        pl.BlockSpec((1, 8, _LANE), lambda i: (i, 0, 0)),
                    ],
                ),
                compiler_params=pltpu.CompilerParams(
                    dimension_semantics=("parallel",),
                    vmem_limit_bytes=vmem_limit,
                ),
            )(h2d, w_return_p, w_aux_p)
            loss_sum = jnp.sum(loss_tiles[:, 0, 0])
        else:
            out_pad = pl.pallas_call(
                _resident_proj_kernel,
                out_shape=jax.ShapeDtypeStruct((Mp, Dp), out_dtype),
                grid_spec=pltpu.PrefetchScalarGridSpec(
                    num_scalar_prefetch=0,
                    grid=(n_tiles,),
                    in_specs=[
                        pl.BlockSpec((tm, Dp), lambda i: (i, 0)),
                        _single_buffered_spec((Dp, Dp), lambda i: (0, 0)),
                    ],
                    out_specs=pl.BlockSpec((tm, Dp), lambda i: (i, 0)),
                ),
                compiler_params=pltpu.CompilerParams(
                    dimension_semantics=("parallel",),
                    vmem_limit_bytes=vmem_limit,
                ),
            )(h2d, w_return_p)
            loss_sum = None
    else:
        # -------- K-tiled path: grid=(rows "parallel", K "arbitrary") ------- #
        if compute_loss:
            out_pad, loss_tiles = pl.pallas_call(
                _ktiled_loss_kernel,
                out_shape=(
                    jax.ShapeDtypeStruct((Mp, Dp), out_dtype),
                    jax.ShapeDtypeStruct((n_tiles, 8, _LANE), jnp.float32),
                ),
                grid_spec=pltpu.PrefetchScalarGridSpec(
                    num_scalar_prefetch=0,
                    grid=(n_tiles, n_k),
                    in_specs=[
                        pl.BlockSpec((tm, tk), lambda i, k: (i, k)),
                        pl.BlockSpec((tk, Dp), lambda i, k: (k, 0)),
                        pl.BlockSpec((tk, Dp), lambda i, k: (k, 0)),
                    ],
                    out_specs=[
                        pl.BlockSpec((tm, Dp), lambda i, k: (i, 0)),
                        pl.BlockSpec((1, 8, _LANE), lambda i, k: (i, 0, 0)),
                    ],
                    scratch_shapes=[
                        pltpu.VMEM((tm, Dp), jnp.float32),
                        pltpu.VMEM((tm, Dp), jnp.float32),
                    ],
                ),
                compiler_params=pltpu.CompilerParams(
                    dimension_semantics=("parallel", "arbitrary"),
                    vmem_limit_bytes=vmem_limit,
                ),
            )(h2d, w_return_p, w_aux_p)
            loss_sum = jnp.sum(loss_tiles[:, 0, 0])
        else:
            out_pad = pl.pallas_call(
                _ktiled_proj_kernel,
                out_shape=jax.ShapeDtypeStruct((Mp, Dp), out_dtype),
                grid_spec=pltpu.PrefetchScalarGridSpec(
                    num_scalar_prefetch=0,
                    grid=(n_tiles, n_k),
                    in_specs=[
                        pl.BlockSpec((tm, tk), lambda i, k: (i, k)),
                        pl.BlockSpec((tk, Dp), lambda i, k: (k, 0)),
                    ],
                    out_specs=pl.BlockSpec((tm, Dp), lambda i, k: (i, 0)),
                    scratch_shapes=[pltpu.VMEM((tm, Dp), jnp.float32)],
                ),
                compiler_params=pltpu.CompilerParams(
                    dimension_semantics=("parallel", "arbitrary"),
                    vmem_limit_bytes=vmem_limit,
                ),
            )(h2d, w_return_p)
            loss_sum = None

    out = out_pad[:M, :D].reshape(B, T, D)
    return out, loss_sum


class AttentionWrapperJAX:
    """JAX/Pallas port of AttentionWrapper's forward semantics (RWKV v7 path)."""

    def __init__(self, layer_idx, hidden_size, *, stage=1, world_size=1,
                 global_rank=0, grad_cp=0, out_dtype=None):
        self.layer_idx = layer_idx
        self.hidden_size = hidden_size
        self.stage = stage
        self.world_size = world_size
        self.global_rank = global_rank
        self.grad_cp = grad_cp   # checkpointing is a training-memory detail; same forward math.
        self.out_dtype = out_dtype  # pass jnp.bfloat16 to halve output HBM writes if tolerated.

        # Deterministic synthetic parameters standing in for the injected modules.
        k1, k2 = jax.random.split(jax.random.PRNGKey(0))
        scale = 1.0 / math.sqrt(hidden_size)
        self.w_student = (jax.random.normal(k1, (hidden_size, hidden_size),
                                            dtype=jnp.float32) * scale)
        self.w_teacher = (jax.random.normal(k2, (hidden_size, hidden_size),
                                            dtype=jnp.float32) * scale)

        # Cast + pad + cache the bf16 weights ONCE (not per forward call).
        Dp = _round_up(hidden_size, _LANE_ALIGN)
        self._w_student_p = _pad_weight(self.w_student, Dp)
        # The teacher branch runs under torch.no_grad() in the reference wrapper.
        self._w_teacher_p = _pad_weight(jax.lax.stop_gradient(self.w_teacher), Dp)

    def __call__(self, hidden_states, v_first_shared_state, attention_mask=None):
        B, T, D = hidden_states.shape
        # v_first = self.v_first_state.shared_state.data[rank].clone(); RWKV-7
        # layers with layer_idx > 0 pass it through unchanged and copy it back.
        v_first = v_first_shared_state[self.global_rank]
        new_v_first_shared_state = v_first_shared_state.at[self.global_rank].set(v_first)

        if self.stage != 1:
            # Projection-only kernel: aux matmul, diff and loss epilogue skipped.
            student, _ = attention_wrapper_pallas(
                hidden_states, self._w_student_p, None, out_dtype=self.out_dtype)
            return (student, None), new_v_first_shared_state

        teacher, loss_sum = attention_wrapper_pallas(
            hidden_states, self._w_teacher_p, self._w_student_p,
            out_dtype=self.out_dtype)
        # special_attn_loss = vector_norm(teacher - student, dim=-1).mean() * D**-0.5
        special_attn_loss = (loss_sum / jnp.float32(B * T)) * jnp.float32(D) ** -0.5
        return (teacher, special_attn_loss), new_v_first_shared_state


if __name__ == "__main__":
    B, T, D = 2, 8, 32          # batch, seq, hidden (small demo shapes)
    WORLD = 1

    key = jax.random.PRNGKey(0)
    kh, kv = jax.random.split(key)
    hidden_states = jax.random.normal(kh, (B, T, D), dtype=jnp.float32)
    v_first_shared = jax.random.normal(kv, (WORLD, B, T, D), dtype=jnp.float32)

    wrapper = AttentionWrapperJAX(layer_idx=1, hidden_size=D, stage=1,
                                  world_size=WORLD, global_rank=0)

    (teacher_out, loss), new_v_first = wrapper(hidden_states, v_first_shared)
    teacher_out = jax.block_until_ready(teacher_out)
    loss = jax.block_until_ready(loss)
    new_v_first = jax.block_until_ready(new_v_first)

    # Pure-JAX reference with the same bf16-operand / f32-accumulate math.
    h_bf = hidden_states.reshape(B * T, D).astype(jnp.bfloat16)
    s_ref = jnp.dot(h_bf, wrapper.w_student.astype(jnp.bfloat16),
                    preferred_element_type=jnp.float32)
    t_ref = jnp.dot(h_bf, wrapper.w_teacher.astype(jnp.bfloat16),
                    preferred_element_type=jnp.float32)
    loss_ref = jnp.mean(jnp.sqrt(jnp.sum((t_ref - s_ref) ** 2, axis=-1))) * (D ** -0.5)

    np.testing.assert_allclose(np.asarray(teacher_out.reshape(B * T, D)),
                               np.asarray(t_ref), rtol=1e-3, atol=1e-3)
    np.testing.assert_allclose(float(loss), float(loss_ref), rtol=1e-3, atol=1e-3)
    np.testing.assert_allclose(np.asarray(new_v_first), np.asarray(v_first_shared))

    # Stage != 1 path (projection-only kernel).
    wrapper_s2 = AttentionWrapperJAX(layer_idx=1, hidden_size=D, stage=2,
                                     world_size=WORLD, global_rank=0)
    (student_out, none_loss), _ = wrapper_s2(hidden_states, v_first_shared)
    student_out = jax.block_until_ready(student_out)
    assert none_loss is None
    np.testing.assert_allclose(np.asarray(student_out.reshape(B * T, D)),
                               np.asarray(s_ref), rtol=1e-3, atol=1e-3)

    # Force the K-tiled (large-D) code paths on the small demo shapes as well.
    t_kt, loss_kt = attention_wrapper_pallas(
        hidden_states, wrapper._w_teacher_p, wrapper._w_student_p,
        force_k_tiled=True, tk=128)
    s_kt, _ = attention_wrapper_pallas(
        hidden_states, wrapper._w_student_p, None, force_k_tiled=True, tk=128)
    t_kt, loss_kt, s_kt = jax.block_until_ready((t_kt, loss_kt, s_kt))
    np.testing.assert_allclose(np.asarray(t_kt.reshape(B * T, D)),
                               np.asarray(t_ref), rtol=1e-3, atol=1e-3)
    np.testing.assert_allclose(np.asarray(s_kt.reshape(B * T, D)),
                               np.asarray(s_ref), rtol=1e-3, atol=1e-3)
    loss_kt_full = (loss_kt / jnp.float32(B * T)) * jnp.float32(D) ** -0.5
    np.testing.assert_allclose(float(loss_kt_full), float(loss_ref),
                               rtol=1e-3, atol=1e-3)

    print("KERNEL_OK")
</pallas_src>

<mosaic_0001>
module attributes {stable_mosaic.version = 11 : i64} {
  func.func @_resident_loss_kernel(%arg0: i32, %arg1: memref<512x256xbf16, #tpu.memory_space<vmem>>, %arg2: memref<256x256xbf16, #tpu.memory_space<vmem>>, %arg3: memref<256x256xbf16, #tpu.memory_space<vmem>>, %arg4: memref<512x256xf32, #tpu.memory_space<vmem>>, %arg5: memref<1x8x128xf32, #tpu.memory_space<vmem>>) attributes {dimension_semantics = [#tpu.dimension_semantics<parallel>], iteration_bounds = array<i64: 1>, scalar_prefetch = 0 : i64, scratch_operands = 0 : i64, tpu.core_type = #tpu.core_type<tc>, window_params = [{transform_indices = @transform_0, window_bounds = array<i64: 512, 256>}, {pipeline_mode = #tpu.pipeline_mode<synchronous>, transform_indices = @transform_1, window_bounds = array<i64: 256, 256>}, {pipeline_mode = #tpu.pipeline_mode<synchronous>, transform_indices = @transform_2, window_bounds = array<i64: 256, 256>}, {transform_indices = @transform_3, window_bounds = array<i64: 512, 256>}, {transform_indices = @transform_4, window_bounds = array<i64: 1, 8, 128>}]} {
    %c0 = arith.constant 0 : index
    %c0_0 = arith.constant 0 : index
    %0 = vector.load %arg1[%c0, %c0_0] : memref<512x256xbf16, #tpu.memory_space<vmem>>, vector<512x256xbf16>
    %c0_1 = arith.constant 0 : index
    %c0_2 = arith.constant 0 : index
    %1 = vector.load %arg2[%c0_1, %c0_2] : memref<256x256xbf16, #tpu.memory_space<vmem>>, vector<256x256xbf16>
    %cst = arith.constant dense<0.000000e+00> : vector<512x256xf32>
    %2 = tpu.matmul %0, %1, %cst {dimension_numbers = #tpu.dot_dimension_numbers<[1], [0], [0], [1], [0, 0, 1, 1], [], []>} : vector<512x256xbf16>, vector<256x256xbf16>, vector<512x256xf32> -> vector<512x256xf32>
    %c0_3 = arith.constant 0 : index
    %c0_4 = arith.constant 0 : index
    %3 = vector.load %arg3[%c0_3, %c0_4] : memref<256x256xbf16, #tpu.memory_space<vmem>>, vector<256x256xbf16>
    %cst_5 = arith.constant dense<0.000000e+00> : vector<512x256xf32>
    %4 = tpu.matmul %0, %3, %cst_5 {dimension_numbers = #tpu.dot_dimension_numbers<[1], [0], [0], [1], [0, 0, 1, 1], [], []>} : vector<512x256xbf16>, vector<256x256xbf16>, vector<512x256xf32> -> vector<512x256xf32>
    %c0_6 = arith.constant 0 : index
    %c0_7 = arith.constant 0 : index
    %5 = vector.load %arg4[%c0_6, %c0_7] : memref<512x256xf32, #tpu.memory_space<vmem>>, vector<512x256xf32>
    tpu.vector_store %arg4[%c0_6, %c0_7], %2 {strides = array<i32>} : memref<512x256xf32, #tpu.memory_space<vmem>>, vector<512x256xf32>,
    %6 = arith.subf %2, %4 : vector<512x256xf32>
    %7 = arith.mulf %6, %6 : vector<512x256xf32>
    %cst_8 = arith.constant dense<0.000000e+00> : vector<512xf32>
    %8 = vector.multi_reduction <add>, %7, %cst_8 [1] : vector<512x256xf32> to vector<512xf32>
    %9 = vector.shape_cast %8 : vector<512xf32> to vector<512x1xf32>
    %10 = math.sqrt %9 : vector<512x1xf32>
    %11 = vector.shape_cast %10 : vector<512x1xf32> to vector<1x512x1xf32>
    %cst_9 = arith.constant dense<0.000000e+00> : vector<1xf32>
    %12 = vector.multi_reduction <add>, %11, %cst_9 [1, 2] : vector<1x512x1xf32> to vector<1xf32>
    %13 = vector.shape_cast %12 : vector<1xf32> to vector<1x1x1xf32>
    %14 = vector.extract %13[0, 0, 0] : f32 from vector<1x1x1xf32>
    %15 = vector.broadcast %14 : f32 to vector<1x8x128xf32>
    %c0_10 = arith.constant 0 : index
    %c0_11 = arith.constant 0 : index
    %c0_12 = arith.constant 0 : index
    %16 = vector.load %arg5[%c0_10, %c0_11, %c0_12] : memref<1x8x128xf32, #tpu.memory_space<vmem>>, vector<1x8x128xf32>
    tpu.vector_store %arg5[%c0_10, %c0_11, %c0_12], %15 {strides = array<i32>} : memref<1x8x128xf32, #tpu.memory_space<vmem>>, vector<1x8x128xf32>,
    return
  }
  func.func @transform_0(%arg0: i32) -> (i32, i32) {
    %c0_i32 = arith.constant 0 : i32
    %c0_i32_0 = arith.constant 0 : i32
    return %arg0, %c0_i32 : i32, i32
  }
  func.func @transform_1(%arg0: i32) -> (i32, i32) {
    %c0_i32 = arith.constant 0 : i32
    %c0_i32_0 = arith.constant 0 : i32
    %c0_i32_1 = arith.constant 0 : i32
    return %c0_i32, %c0_i32_0 : i32, i32
  }
  func.func @transform_2(%arg0: i32) -> (i32, i32) {
    %c0_i32 = arith.constant 0 : i32
    %c0_i32_0 = arith.constant 0 : i32
    %c0_i32_1 = arith.constant 0 : i32
    return %c0_i32, %c0_i32_0 : i32, i32
  }
  func.func @transform_3(%arg0: i32) -> (i32, i32) {
    %c0_i32 = arith.constant 0 : i32
    %c0_i32_0 = arith.constant 0 : i32
    return %arg0, %c0_i32 : i32, i32
  }
  func.func @transform_4(%arg0: i32) -> (i32, i32, i32) {
    %c0_i32 = arith.constant 0 : i32
    %c0_i32_0 = arith.constant 0 : i32
    %c0_i32_1 = arith.constant 0 : i32
    return %arg0, %c0_i32, %c0_i32_0 : i32, i32, i32
  }
}

</mosaic_0001>

<bundles_post_ra>
// kernel: tpu_custom_call.1
= control target key start
LH: loop header
LB: loop body
LE: loop exit
PB: predicated region body
PF: predicated region fallthrough
CT: control target
= control target key end

     0   :  { %10 = vsyncpa [#allocation3], 0  ;;  %s3960_s0 = inlined_call_operand.hbm [shape: bf16[512,256], index: 0, kind: input, shape index: {}]   ;;  %s3961_s1 = inlined_call_operand.hbm [shape: bf16[256,256], index: 1, kind: input, shape index: {}]   ;;  %s3962_s2 = inlined_call_operand.hbm [shape: bf16[256,256], index: 2, kind: input, shape index: {}]   ;;  %s3963_s3 = inlined_call_operand.hbm [shape: f32[512,256], index: 3, kind: output, shape index: {0}]   ;;  %s3964_s4 = inlined_call_operand.hbm [shape: f32[1,8,128], index: 4, kind: output, shape index: {1}]  }
   0x1   :  { %11 = vsyncpa [#allocation6], 0 }
   0x2   :  { %12 = vsyncpa [#allocation4], 0 }
   0x3   :  { %13 = vsyncpa [#allocation10], 0  ;;  %s3295_s15 = smov [#allocation5]   ;;  %s3296_s17 = smov [#allocation2]  }
   0x4   :  { %s31_s16 = sshll.u32 %s3295_s15, 4  ;;  %s19_s18 = sshll.u32 %s3296_s17, 4  ;;  %s32_s16 = int_to_ptr.vmem [resolvable:$true] %s31_s16  ;;  %s20_s18 = int_to_ptr.vmem [resolvable:$true] %s19_s18 }
   0x5   :  { %s3195_s19 = scalar_lea.vmem %s32_s16, 4096  ;;  %p3200_p1 = scmp.lt.s32.totalorder %s32_s16, %s32_s16 }
   0x6   :  { %p3196_p0 = scmp.ne.s32.totalorder %s32_s16, %s3195_s19  ;;  %p3201_p2 = scmp.lt.s32.totalorder %s3195_s19, %s3195_s19 }
   0x8   :  { %p3202_p3 = por %p3201_p2, %p3200_p1 }
   0xa   :  { %p3203_p4 = pnand %p3202_p3, %p3196_p0 }
   0xc   :  { %3206 = shalt.err (!%p3203_p4)
}
   0xd   :  { %s3297_s20 = smov 128   ;;  %s3298_s21 = smov 8  }
   0xe   :  { %37 = dma.hbm_to_vmem [thread:$0]  %s3961_s1, 4096, %s32_s16, [#allocation6], %s3297_s20, %s3297_s20, %s3298_s21  }
   0xf   :  { %s3215_s24 = scalar_lea.vmem %s20_s18, 8192  ;;  %p3220_p6 = scmp.lt.s32.totalorder %s20_s18, %s20_s18 }
  0x10   :  { %p3216_p5 = scmp.ne.s32.totalorder %s20_s18, %s3215_s24  ;;  %p3221_p7 = scmp.lt.s32.totalorder %s3215_s24, %s3215_s24 }
  0x12   :  { %p3222_p8 = por %p3221_p7, %p3220_p6 }
  0x14   :  { %p3223_p9 = pnand %p3222_p8, %p3216_p5 }
  0x16   :  { %3226 = shalt.err (!%p3223_p9)
}
  0x17   :  { %25 = dma.hbm_to_vmem [thread:$0]  %s3960_s0, 8192, %s20_s18, [#allocation3], %s3297_s20, %s3297_s20, %s3298_s21  }
  0x18   :  { %s3299_s27 = smov [#allocation7]  }
  0x19   :  { %s43_s28 = sshll.u32 %s3299_s27, 4  ;;  %s44_s28 = int_to_ptr.vmem [resolvable:$true] %s43_s28 }
  0x1a   :  { %s3235_s29 = scalar_lea.vmem %s44_s28, 4096  ;;  %p3240_p11 = scmp.lt.s32.totalorder %s44_s28, %s44_s28 }
  0x1b   :  { %p3236_p10 = scmp.ne.s32.totalorder %s44_s28, %s3235_s29  ;;  %p3241_p12 = scmp.lt.s32.totalorder %s3235_s29, %s3235_s29 }
  0x1d   :  { %p3242_p13 = por %p3241_p12, %p3240_p11 }
  0x1f   :  { %p3243_p0 = pnand %p3242_p13, %p3236_p10 }
  0x21   :  { %3246 = shalt.err (!%p3243_p0)
}
  0x22   :  { %49 = dma.hbm_to_vmem [thread:$0]  %s3962_s2, 4096, %s44_s28, [#allocation6], %s3297_s20, %s3297_s20, %s3298_s21  }
  0x23   :  { %3287 = dma.done.wait [#allocation3], 8192  }
  0x24   :  { %3288 = vsyncadd [#allocation3], 4294959104 }
  0x25   :  { %3289 = dma.done.wait [#allocation6], 8192  }
  0x26   :  { %3290 = vsyncadd [#allocation6], 4294959104  ;;  %v2867_v0 = vld [vmem:[#allocation5 + $0x74] ss:$8 sps:$4 sm:$0xff]   ;;  %v2871_v2 = vld [vmem:[#allocation5 + $0x70] ss:$8 sps:$4 sm:$0xff]  }
  0x27   :  { %v2869_v1 = vld [vmem:[#allocation7 + $0x74] ss:$8 sps:$4 sm:$0xff]   ;;  %635 = vmatprep.subr.bf16.mxu0 %v2867_v0  ;;  %v2872_v3 = vld [vmem:[#allocation7 + $0x70] ss:$8 sps:$4 sm:$0xff]   ;;  %v2873_v4 = vld [vmem:[#allocation5 + $0x64] ss:$8 sps:$4 sm:$0xff]  }
  0x28   :  { %1180 = vmatprep.subr.bf16.mxu1 %v2869_v1  ;;  %636 = vmatpush1.bf16.msra.mxu0 %v2871_v2  ;;  %v2875_v5 = vld [vmem:[#allocation7 + $0x64] ss:$8 sps:$4 sm:$0xff]   ;;  %v2877_v6 = vld [vmem:[#allocation5 + $0x60] ss:$8 sps:$4 sm:$0xff]   ;;  %v2879_v8 = vld [vmem:[#allocation5 + $0x54] ss:$8 sps:$4 sm:$0xff]  }
  0x29   :  { %1181 = vmatpush1.bf16.msra.mxu1 %v2872_v3  ;;  %637 = vmatprep.subr.bf16.mxu0 %v2873_v4  ;;  %v2878_v7 = vld [vmem:[#allocation7 + $0x60] ss:$8 sps:$4 sm:$0xff]   ;;  %v2881_v9 = vld [vmem:[#allocation7 + $0x54] ss:$8 sps:$4 sm:$0xff]   ;;  %v2883_v10 = vld [vmem:[#allocation5 + $0x50] ss:$8 sps:$4 sm:$0xff]  }
  0x2a   :  { %1182 = vmatprep.subr.bf16.mxu1 %v2875_v5  ;;  %v2884_v11 = vld [vmem:[#allocation7 + $0x50] ss:$8 sps:$4 sm:$0xff]   ;;  %v2885_v12 = vld [vmem:[#allocation5 + $0x44] ss:$8 sps:$4 sm:$0xff]   ;;  %v2889_v14 = vld [vmem:[#allocation5 + $0x40] ss:$8 sps:$4 sm:$0xff]  }
  0x2b   :  { %v2887_v13 = vld [vmem:[#allocation7 + $0x44] ss:$8 sps:$4 sm:$0xff]   ;;  %v2890_v15 = vld [vmem:[#allocation7 + $0x40] ss:$8 sps:$4 sm:$0xff]   ;;  %v2891_v16 = vld [vmem:[#allocation5 + $0x34] ss:$8 sps:$4 sm:$0xff]  }
  0x2c   :  { %638 = vmatpush1.bf16.msra.mxu0 %v2877_v6  ;;  %v2893_v17 = vld [vmem:[#allocation7 + $0x34] ss:$8 sps:$4 sm:$0xff]   ;;  %v2895_v18 = vld [vmem:[#allocation5 + $0x30] ss:$8 sps:$4 sm:$0xff]   ;;  %v2897_v20 = vld [vmem:[#allocation5 + $0x24] ss:$8 sps:$4 sm:$0xff]  }
  0x2d   :  { %1183 = vmatpush1.bf16.msra.mxu1 %v2878_v7  ;;  %639 = vmatprep.subr.bf16.mxu0 %v2879_v8  ;;  %v2896_v19 = vld [vmem:[#allocation7 + $0x30] ss:$8 sps:$4 sm:$0xff]   ;;  %v2899_v21 = vld [vmem:[#allocation7 + $0x24] ss:$8 sps:$4 sm:$0xff]   ;;  %v2901_v22 = vld [vmem:[#allocation5 + $0x20] ss:$8 sps:$4 sm:$0xff]  }
  0x2e   :  { %1184 = vmatprep.subr.bf16.mxu1 %v2881_v9  ;;  %v2902_v23 = vld [vmem:[#allocation7 + $0x20] ss:$8 sps:$4 sm:$0xff]   ;;  %v2903_v24 = vld [vmem:[#allocation5 + $0x14] ss:$8 sps:$4 sm:$0xff]   ;;  %v2907_v26 = vld [vmem:[#allocation5 + $0x10] ss:$8 sps:$4 sm:$0xff]  }
  0x2f   :  { %v2905_v25 = vld [vmem:[#allocation7 + $0x14] ss:$8 sps:$4 sm:$0xff]   ;;  %v2908_v27 = vld [vmem:[#allocation7 + $0x10] ss:$8 sps:$4 sm:$0xff]   ;;  %v2909_v28 = vld [vmem:[#allocation5 + $0x4] ss:$8 sps:$4 sm:$0xff]  }
  0x30   :  { %640 = vmatpush1.bf16.msra.mxu0 %v2883_v10  ;;  %v2911_v29 = vld [vmem:[#allocation7 + $0x4] ss:$8 sps:$4 sm:$0xff]   ;;  %v2913_v30 = vld [vmem:[#allocation5] ss:$8 sps:$4 sm:$0xff]   ;;  %v2915_v32 = vld [vmem:[#allocation5 + $0xf4] ss:$8 sps:$4 sm:$0xff]  }
  0x31   :  { %1185 = vmatpush1.bf16.msra.mxu1 %v2884_v11  ;;  %641 = vmatprep.subr.bf16.mxu0 %v2885_v12  ;;  %v2914_v31 = vld [vmem:[#allocation7] ss:$8 sps:$4 sm:$0xff]   ;;  %v2917_v33 = vld [vmem:[#allocation7 + $0xf4] ss:$8 sps:$4 sm:$0xff]   ;;  %v2919_v34 = vld [vmem:[#allocation5 + $0xf0] ss:$8 sps:$4 sm:$0xff]  }
  0x32   :  { %1186 = vmatprep.subr.bf16.mxu1 %v2887_v13  ;;  %v2920_v35 = vld [vmem:[#allocation7 + $0xf0] ss:$8 sps:$4 sm:$0xff]   ;;  %v2921_v36 = vld [vmem:[#allocation5 + $0xe4] ss:$8 sps:$4 sm:$0xff]   ;;  %v2925_v38 = vld [vmem:[#allocation5 + $0xe0] ss:$8 sps:$4 sm:$0xff]  }
  0x33   :  { %v2923_v37 = vld [vmem:[#allocation7 + $0xe4] ss:$8 sps:$4 sm:$0xff]   ;;  %v2926_v39 = vld [vmem:[#allocation7 + $0xe0] ss:$8 sps:$4 sm:$0xff]   ;;  %v2927_v40 = vld [vmem:[#allocation5 + $0xd4] ss:$8 sps:$4 sm:$0xff]  }
  0x34   :  { %642 = vmatpush1.bf16.msra.mxu0 %v2889_v14  ;;  %v2929_v41 = vld [vmem:[#allocation7 + $0xd4] ss:$8 sps:$4 sm:$0xff]   ;;  %v2931_v42 = vld [vmem:[#allocation5 + $0xd0] ss:$8 sps:$4 sm:$0xff]   ;;  %v2933_v44 = vld [vmem:[#allocation5 + $0xc4] ss:$8 sps:$4 sm:$0xff]  }
  0x35   :  { %1187 = vmatpush1.bf16.msra.mxu1 %v2890_v15  ;;  %643 = vmatprep.subr.bf16.mxu0 %v2891_v16  ;;  %v2932_v43 = vld [vmem:[#allocation7 + $0xd0] ss:$8 sps:$4 sm:$0xff]   ;;  %v2935_v45 = vld [vmem:[#allocation7 + $0xc4] ss:$8 sps:$4 sm:$0xff]   ;;  %v2937_v46 = vld [vmem:[#allocation5 + $0xc0] ss:$8 sps:$4 sm:$0xff]  }
  0x36   :  { %1188 = vmatprep.subr.bf16.mxu1 %v2893_v17  ;;  %v2938_v47 = vld [vmem:[#allocation7 + $0xc0] ss:$8 sps:$4 sm:$0xff]   ;;  %v2965_v48 = vld [vmem:[#allocation2 + $0x4] ss:$8 sps:$4 sm:$0xff]   ;;  %v2939_v49 = vld [vmem:[#allocation5 + $0xb4] ss:$8 sps:$4 sm:$0xff]  }
  0x37   :  { %v2941_v50 = vld [vmem:[#allocation7 + $0xb4] ss:$8 sps:$4 sm:$0xff]   ;;  %667 = vmatprep.mubr.bf16.mxu0 %v2965_v48  ;;  %1212 = vmatprep.mubr.bf16.mxu1 %v2965_v48  ;;  %v2943_v51 = vld [vmem:[#allocation5 + $0xb0] ss:$8 sps:$4 sm:$0xff]   ;;  %v2945_v53 = vld [vmem:[#allocation5 + $0xa4] ss:$8 sps:$4 sm:$0xff]  }
  0x38   :  { %644 = vmatpush1.bf16.msra.mxu0 %v2895_v18  ;;  %v2944_v52 = vld [vmem:[#allocation7 + $0xb0] ss:$8 sps:$4 sm:$0xff]   ;;  %v2947_v54 = vld [vmem:[#allocation7 + $0xa4] ss:$8 sps:$4 sm:$0xff]   ;;  %v2949_v55 = vld [vmem:[#allocation5 + $0xa0] ss:$8 sps:$4 sm:$0xff]  }
  0x39   :  { %1189 = vmatpush1.bf16.msra.mxu1 %v2896_v19  ;;  %645 = vmatprep.subr.bf16.mxu0 %v2897_v20  ;;  %v2950_v56 = vld [vmem:[#allocation7 + $0xa0] ss:$8 sps:$4 sm:$0xff]   ;;  %v2951_v57 = vld [vmem:[#allocation5 + $0x94] ss:$8 sps:$4 sm:$0xff]   ;;  %v2955_v59 = vld [vmem:[#allocation5 + $0x90] ss:$8 sps:$4 sm:$0xff]  }
  0x3a   :  { %1190 = vmatprep.subr.bf16.mxu1 %v2899_v21  ;;  %v2953_v58 = vld [vmem:[#allocation7 + $0x94] ss:$8 sps:$4 sm:$0xff]   ;;  %v2956_v60 = vld [vmem:[#allocation7 + $0x90] ss:$8 sps:$4 sm:$0xff]   ;;  %v2957_v61 = vld [vmem:[#allocation5 + $0x84] ss:$8 sps:$4 sm:$0xff]  }
  0x3b   :  { %v2959_v62 = vld [vmem:[#allocation7 + $0x84] ss:$8 sps:$4 sm:$0xff]   ;;  %v2961_v63 = vld [vmem:[#allocation5 + $0x80] ss:$8 sps:$4 sm:$0xff]   ;;  %v2966_v2 = vld [vmem:[#allocation2 + $0x14] ss:$8 sps:$4 sm:$0xff]  }
  0x3c   :  { %646 = vmatpush1.bf16.msra.mxu0 %v2901_v22  ;;  %v2962_v0 = vld [vmem:[#allocation7 + $0x80] ss:$8 sps:$4 sm:$0xff]   ;;  %v2968_v3 = vld [vmem:[#allocation2 + $0x10] ss:$8 sps:$4 sm:$0xff]   ;;  %v2969_v4 = vld [vmem:[#allocation2 + $0x24] ss:$8 sps:$4 sm:$0xff]  }
  0x3d   :  { %1191 = vmatpush1.bf16.msra.mxu1 %v2902_v23  ;;  %647 = vmatprep.subr.bf16.mxu0 %v2903_v24  ;;  %v2963_v1 = vld [vmem:[#allocation2] ss:$8 sps:$4 sm:$0xff]   ;;  %v2972_v6 = vld [vmem:[#allocation2 + $0x34] ss:$8 sps:$4 sm:$0xff]   ;;  %v2974_v7 = vld [vmem:[#allocation2 + $0x30] ss:$8 sps:$4 sm:$0xff]  }
  0x3e   :  { %1192 = vmatprep.subr.bf16.mxu1 %v2905_v25  ;;  %v2971_v5 = vld [vmem:[#allocation2 + $0x20] ss:$8 sps:$4 sm:$0xff]   ;;  %v2975_v8 = vld [vmem:[#allocation2 + $0x44] ss:$8 sps:$4 sm:$0xff]   ;;  %v2978_v10 = vld [vmem:[#allocation2 + $0x54] ss:$8 sps:$4 sm:$0xff]  }
  0x3f   :  { %v2977_v9 = vld [vmem:[#allocation2 + $0x40] ss:$8 sps:$4 sm:$0xff]   ;;  %v2980_v11 = vld [vmem:[#allocation2 + $0x50] ss:$8 sps:$4 sm:$0xff]   ;;  %v2981_v12 = vld [vmem:[#allocation2 + $0x64] ss:$8 sps:$4 sm:$0xff]  }
  0x40   :  { %648 = vmatpush1.bf16.msra.mxu0 %v2907_v26  ;;  %v2983_v13 = vld [vmem:[#allocation2 + $0x60] ss:$8 sps:$4 sm:$0xff]   ;;  %v2984_v14 = vld [vmem:[#allocation2 + $0x74] ss:$8 sps:$4 sm:$0xff]   ;;  %v2986_v15 = vld [vmem:[#allocation2 + $0x70] ss:$8 sps:$4 sm:$0xff]  }
  0x41   :  { %1193 = vmatpush1.bf16.msra.mxu1 %v2908_v27  ;;  %649 = vmatprep.subr.bf16.mxu0 %v2909_v28  ;;  %v2987_v16 = vld [vmem:[#allocation2 + $0x84] ss:$8 sps:$4 sm:$0xff]   ;;  %v2989_v17 = vld [vmem:[#allocation2 + $0x80] ss:$8 sps:$4 sm:$0xff]   ;;  %v2990_v18 = vld [vmem:[#allocation2 + $0x94] ss:$8 sps:$4 sm:$0xff]  }
  0x42   :  { %1194 = vmatprep.subr.bf16.mxu1 %v2911_v29  ;;  %v2992_v19 = vld [vmem:[#allocation2 + $0x90] ss:$8 sps:$4 sm:$0xff]   ;;  %v2993_v20 = vld [vmem:[#allocation2 + $0xa4] ss:$8 sps:$4 sm:$0xff]   ;;  %v2995_v21 = vld [vmem:[#allocation2 + $0xa0] ss:$8 sps:$4 sm:$0xff]  }
  0x43   :  { %v2996_v22 = vld [vmem:[#allocation2 + $0xb4] ss:$8 sps:$4 sm:$0xff]   ;;  %v2998_v23 = vld [vmem:[#allocation2 + $0xb0] ss:$8 sps:$4 sm:$0xff]   ;;  %v2999_v24 = vld [vmem:[#allocation2 + $0xc4] ss:$8 sps:$4 sm:$0xff]  }
  0x44   :  { %650 = vmatpush1.bf16.msra.mxu0 %v2913_v30  ;;  %v3001_v25 = vld [vmem:[#allocation2 + $0xc0] ss:$8 sps:$4 sm:$0xff]   ;;  %v3002_v26 = vld [vmem:[#allocation2 + $0xd4] ss:$8 sps:$4 sm:$0xff]   ;;  %v3004_v27 = vld [vmem:[#allocation2 + $0xd0] ss:$8 sps:$4 sm:$0xff]  }
  0x45   :  { %1195 = vmatpush1.bf16.msra.mxu1 %v2914_v31  ;;  %651 = vmatprep.subr.bf16.mxu0 %v2915_v32  ;;  %v3005_v28 = vld [vmem:[#allocation2 + $0xe4] ss:$8 sps:$4 sm:$0xff]   ;;  %v3007_v29 = vld [vmem:[#allocation2 + $0xe0] ss:$8 sps:$4 sm:$0xff]   ;;  %v3008_v30 = vld [vmem:[#allocation2 + $0xf4] ss:$8 sps:$4 sm:$0xff]  }
  0x46   :  { %1196 = vmatprep.subr.bf16.mxu1 %v2917_v33  ;;  %v3010_v31 = vld [vmem:[#allocation2 + $0xf0] ss:$8 sps:$4 sm:$0xff]   ;;  %v3011_v32 = vld [vmem:[#allocation2 + $0x104] ss:$8 sps:$4 sm:$0xff]   ;;  %v3013_v33 = vld [vmem:[#allocation2 + $0x100] ss:$8 sps:$4 sm:$0xff]  }
  0x47   :  { %v3035_v48 = vld [vmem:[#allocation2 + $0x184] ss:$8 sps:$4 sm:$0xff]   ;;  %vm2557_vm1 = vcmask 7168   ;;  %s3300_s0 = smov [#allocation8]  }
  0x48   :  { %652 = vmatpush2.bf16.msra.mxu0 %v2919_v34  ;;  %v3014_v34 = vld [vmem:[#allocation2 + $0x114] ss:$8 sps:$4 sm:$0xff]   ;;  %s2701_s2 = sshll.u32 %s3300_s0, 4  ;;  %s2702_s2 = int_to_ptr.vmem [resolvable:$true] %s2701_s2 }
  0x49   :  { %1197 = vmatpush2.bf16.msra.mxu1 %v2920_v35  ;;  %653 = vmatprep.subr.bf16.mxu0 %v2921_v36  ;;  %v3016_v35 = vld [vmem:[#allocation2 + $0x110] ss:$8 sps:$4 sm:$0xff]   ;;  %v3017_v36 = vld [vmem:[#allocation2 + $0x124] ss:$8 sps:$4 sm:$0xff]   ;;  %s3247_s5 = scalar_lea.vmem %s2702_s2, 16384  ;;  %p3252_p2 = scmp.lt.s32.totalorder %s2702_s2, %s2702_s2 }
  0x4a   :  { %1198 = vmatprep.subr.bf16.mxu1 %v2923_v37  ;;  %v3019_v37 = vld [vmem:[#allocation2 + $0x120] ss:$8 sps:$4 sm:$0xff]   ;;  %p3248_p1 = scmp.ne.s32.totalorder %s2702_s2, %s3247_s5  ;;  %p3253_p3 = scmp.lt.s32.totalorder %s3247_s5, %s3247_s5 }
  0x4c   :  { %654 = vmatpush2.bf16.msra.mxu0 %v2925_v38  ;;  %v3020_v38 = vld [vmem:[#allocation2 + $0x134] ss:$8 sps:$4 sm:$0xff]   ;;  %p3254_p4 = por %p3253_p3, %p3252_p2 }
  0x4d   :  { %1199 = vmatpush2.bf16.msra.mxu1 %v2926_v39  ;;  %655 = vmatprep.subr.bf16.mxu0 %v2927_v40  ;;  %v3022_v39 = vld [vmem:[#allocation2 + $0x130] ss:$8 sps:$4 sm:$0xff]   ;;  %v3023_v40 = vld [vmem:[#allocation2 + $0x144] ss:$8 sps:$4 sm:$0xff]  }
  0x4e   :  { %1200 = vmatprep.subr.bf16.mxu1 %v2929_v41  ;;  %v3025_v41 = vld [vmem:[#allocation2 + $0x140] ss:$8 sps:$4 sm:$0xff]   ;;  %p3255_p5 = pnand %p3254_p4, %p3248_p1 }
  0x50   :  { %656 = vmatpush2.bf16.msra.mxu0 %v2931_v42  ;;  %v3026_v42 = vld [vmem:[#allocation2 + $0x154] ss:$8 sps:$4 sm:$0xff]  }
  0x51   :  { %1201 = vmatpush2.bf16.msra.mxu1 %v2932_v43  ;;  %657 = vmatprep.subr.bf16.mxu0 %v2933_v44  ;;  %v3028_v43 = vld [vmem:[#allocation2 + $0x150] ss:$8 sps:$4 sm:$0xff]   ;;  %v3029_v44 = vld [vmem:[#allocation2 + $0x164] ss:$8 sps:$4 sm:$0xff]  }
  0x52   :  { %1202 = vmatprep.subr.bf16.mxu1 %v2935_v45  ;;  %v3031_v45 = vld [vmem:[#allocation2 + $0x160] ss:$8 sps:$4 sm:$0xff]  }
  0x54   :  { %658 = vmatpush2.bf16.msra.mxu0 %v2937_v46  ;;  %v3032_v46 = vld [vmem:[#allocation2 + $0x174] ss:$8 sps:$4 sm:$0xff]  }
  0x55   :  { %1203 = vmatpush2.bf16.msra.mxu1 %v2938_v47  ;;  %659 = vmatprep.subr.bf16.mxu0 %v2939_v49  ;;  %v3034_v47 = vld [vmem:[#allocation2 + $0x170] ss:$8 sps:$4 sm:$0xff]   ;;  %v3037_v49 = vld [vmem:[#allocation2 + $0x180] ss:$8 sps:$4 sm:$0xff]  }
  0x56   :  { %1204 = vmatprep.subr.bf16.mxu1 %v2941_v50  ;;  %v3038_v50 = vld [vmem:[#allocation2 + $0x194] ss:$8 sps:$4 sm:$0xff]  }
  0x58   :  { %660 = vmatpush2.bf16.msra.mxu0 %v2943_v51 }
  0x59   :  { %1205 = vmatpush2.bf16.msra.mxu1 %v2944_v52  ;;  %661 = vmatprep.subr.bf16.mxu0 %v2945_v53 }
  0x5a   :  { %1206 = vmatprep.subr.bf16.mxu1 %v2947_v54 }
  0x5c   :  { %662 = vmatpush2.bf16.msra.mxu0 %v2949_v55 }
  0x5d   :  { %1207 = vmatpush2.bf16.msra.mxu1 %v2950_v56  ;;  %663 = vmatprep.subr.bf16.mxu0 %v2951_v57 }
  0x5e   :  { %1208 = vmatprep.subr.bf16.mxu1 %v2953_v58 }
  0x60   :  { %664 = vmatpush2.bf16.msra.mxu0 %v2955_v59  ;;  %v3040_v59 = vld [vmem:[#allocation2 + $0x190] ss:$8 sps:$4 sm:$0xff]  }
  0x61   :  { %1209 = vmatpush2.bf16.msra.mxu1 %v2956_v60  ;;  %665 = vmatprep.subr.bf16.mxu0 %v2957_v61 }
  0x62   :  { %1210 = vmatprep.subr.bf16.mxu1 %v2959_v62 }
  0x64   :  { %666 = vmatpush2.bf16.msra.mxu0 %v2961_v63  ;;  %v3041_v63 = vld [vmem:[#allocation2 + $0x1a4] ss:$8 sps:$4 sm:$0xff]  }
  0x65   :  { %1211 = vmatpush2.bf16.msra.mxu1 %v2962_v0 }
  0x67   :  { %668 = vmatmul.mubr.bf16.vlgmr.msra.gmra.mxu0 %v2963_v1 }
  0x68   :  { %1213 = vmatmul.mubr.bf16.vlgmr.msra.gmra.mxu1 %v2963_v1  ;;  %677 = vmatprep.mubr.bf16.mxu0 %v2966_v2 }
  0x69   :  { %1222 = vmatprep.mubr.bf16.mxu1 %v2966_v2 }
  0x6f   :  { %678 = vmatmul.mubr.bf16.gmra.mxu0 %v2968_v3 }
  0x70   :  { %1223 = vmatmul.mubr.bf16.gmra.mxu1 %v2968_v3  ;;  %687 = vmatprep.mubr.bf16.mxu0 %v2969_v4 }
  0x71   :  { %1232 = vmatprep.mubr.bf16.mxu1 %v2969_v4 }
  0x77   :  { %688 = vmatmul.mubr.bf16.gmra.mxu0 %v2971_v5 }
  0x78   :  { %1233 = vmatmul.mubr.bf16.gmra.mxu1 %v2971_v5  ;;  %697 = vmatprep.mubr.bf16.mxu0 %v2972_v6 }
  0x79   :  { %1242 = vmatprep.mubr.bf16.mxu1 %v2972_v6 }
  0x7f   :  { %698 = vmatmul.mubr.bf16.gmra.mxu0 %v2974_v7 }
  0x80   :  { %1243 = vmatmul.mubr.bf16.gmra.mxu1 %v2974_v7  ;;  %707 = vmatprep.mubr.bf16.mxu0 %v2975_v8 }
  0x81   :  { %1252 = vmatprep.mubr.bf16.mxu1 %v2975_v8 }
  0x87   :  { %708 = vmatmul.mubr.bf16.gmra.mxu0 %v2977_v9 }
  0x88   :  { %1253 = vmatmul.mubr.bf16.gmra.mxu1 %v2977_v9  ;;  %717 = vmatprep.mubr.bf16.mxu0 %v2978_v10 }
  0x89   :  { %1262 = vmatprep.mubr.bf16.mxu1 %v2978_v10 }
  0x8f   :  { %718 = vmatmul.mubr.bf16.gmra.mxu0 %v2980_v11 }
  0x90   :  { %1263 = vmatmul.mubr.bf16.gmra.mxu1 %v2980_v11  ;;  %727 = vmatprep.mubr.bf16.mxu0 %v2981_v12 }
  0x91   :  { %1272 = vmatprep.mubr.bf16.mxu1 %v2981_v12 }
  0x97   :  { %728 = vmatmul.mubr.bf16.gmra.mxu0 %v2983_v13 }
  0x98   :  { %1273 = vmatmul.mubr.bf16.gmra.mxu1 %v2983_v13  ;;  %737 = vmatprep.mubr.bf16.mxu0 %v2984_v14 }
  0x99   :  { %1282 = vmatprep.mubr.bf16.mxu1 %v2984_v14 }
  0x9f   :  { %738 = vmatmul.mubr.bf16.gmra.mxu0 %v2986_v15 }
  0xa0   :  { %1283 = vmatmul.mubr.bf16.gmra.mxu1 %v2986_v15  ;;  %747 = vmatprep.mubr.bf16.mxu0 %v2987_v16  ;;  %v3043_v15 = vld [vmem:[#allocation2 + $0x1a0] ss:$8 sps:$4 sm:$0xff]  }
  0xa1   :  { %1292 = vmatprep.mubr.bf16.mxu1 %v2987_v16 }
  0xa7   :  { %748 = vmatmul.mubr.bf16.gmra.mxu0 %v2989_v17 }
  0xa8   :  { %1293 = vmatmul.mubr.bf16.gmra.mxu1 %v2989_v17  ;;  %757 = vmatprep.mubr.bf16.mxu0 %v2990_v18 }
  0xa9   :  { %1302 = vmatprep.mubr.bf16.mxu1 %v2990_v18 }
  0xaf   :  { %758 = vmatmul.mubr.bf16.gmra.mxu0 %v2992_v19 }
  0xb0   :  { %1303 = vmatmul.mubr.bf16.gmra.mxu1 %v2992_v19  ;;  %767 = vmatprep.mubr.bf16.mxu0 %v2993_v20  ;;  %v3044_v19 = vld [vmem:[#allocation2 + $0x1b4] ss:$8 sps:$4 sm:$0xff]  }
  0xb1   :  { %1312 = vmatprep.mubr.bf16.mxu1 %v2993_v20 }
  0xb7   :  { %768 = vmatmul.mubr.bf16.gmra.mxu0 %v2995_v21 }
  0xb8   :  { %1313 = vmatmul.mubr.bf16.gmra.mxu1 %v2995_v21  ;;  %777 = vmatprep.mubr.bf16.mxu0 %v2996_v22 }
  0xb9   :  { %1322 = vmatprep.mubr.bf16.mxu1 %v2996_v22 }
  0xbf   :  { %778 = vmatmul.mubr.bf16.gmra.mxu0 %v2998_v23 }
  0xc0   :  { %1323 = vmatmul.mubr.bf16.gmra.mxu1 %v2998_v23  ;;  %787 = vmatprep.mubr.bf16.mxu0 %v2999_v24 }
  0xc1   :  { %1332 = vmatprep.mubr.bf16.mxu1 %v2999_v24 }
  0xc7   :  { %788 = vmatmul.mubr.bf16.gmra.mxu0 %v3001_v25 }
  0xc8   :  { %1333 = vmatmul.mubr.bf16.gmra.mxu1 %v3001_v25  ;;  %797 = vmatprep.mubr.bf16.mxu0 %v3002_v26 }
  0xc9   :  { %1342 = vmatprep.mubr.bf16.mxu1 %v3002_v26 }
  0xcf   :  { %798 = vmatmul.mubr.bf16.gmra.mxu0 %v3004_v27 }
  0xd0   :  { %1343 = vmatmul.mubr.bf16.gmra.mxu1 %v3004_v27  ;;  %807 = vmatprep.mubr.bf16.mxu0 %v3005_v28 }
  0xd1   :  { %1352 = vmatprep.mubr.bf16.mxu1 %v3005_v28 }
  0xd7   :  { %808 = vmatmul.mubr.bf16.gmra.mxu0 %v3007_v29 }
  0xd8   :  { %1353 = vmatmul.mubr.bf16.gmra.mxu1 %v3007_v29  ;;  %817 = vmatprep.mubr.bf16.mxu0 %v3008_v30 }
  0xd9   :  { %1362 = vmatprep.mubr.bf16.mxu1 %v3008_v30 }
  0xdf   :  { %818 = vmatmul.mubr.bf16.gmra.mxu0 %v3010_v31 }
  0xe0   :  { %1363 = vmatmul.mubr.bf16.gmra.mxu1 %v3010_v31  ;;  %827 = vmatprep.mubr.bf16.mxu0 %v3011_v32 }
  0xe1   :  { %1372 = vmatprep.mubr.bf16.mxu1 %v3011_v32 }
  0xe7   :  { %828 = vmatmul.mubr.bf16.gmra.mxu0 %v3013_v33 }
  0xe8   :  { %1373 = vmatmul.mubr.bf16.gmra.mxu1 %v3013_v33  ;;  %837 = vmatprep.mubr.bf16.mxu0 %v3014_v34 }
  0xe9   :  { %1382 = vmatprep.mubr.bf16.mxu1 %v3014_v34 }
  0xef   :  { %838 = vmatmul.mubr.bf16.gmra.mxu0 %v3016_v35 }
  0xf0   :  { %1383 = vmatmul.mubr.bf16.gmra.mxu1 %v3016_v35  ;;  %847 = vmatprep.mubr.bf16.mxu0 %v3017_v36  ;;  %v3046_v35 = vld [vmem:[#allocation2 + $0x1b0] ss:$8 sps:$4 sm:$0xff]  }
  0xf1   :  { %1392 = vmatprep.mubr.bf16.mxu1 %v3017_v36 }
  0xf7   :  { %848 = vmatmul.mubr.bf16.gmra.mxu0 %v3019_v37 }
  0xf8   :  { %1393 = vmatmul.mubr.bf16.gmra.mxu1 %v3019_v37  ;;  %857 = vmatprep.mubr.bf16.mxu0 %v3020_v38 }
  0xf9   :  { %1402 = vmatprep.mubr.bf16.mxu1 %v3020_v38 }
  0xff   :  { %858 = vmatmul.mubr.bf16.gmra.mxu0 %v3022_v39 }
 0x100   :  { %1403 = vmatmul.mubr.bf16.gmra.mxu1 %v3022_v39  ;;  %867 = vmatprep.mubr.bf16.mxu0 %v3023_v40  ;;  %v3049_v39 = vld [vmem:[#allocation2 + $0x1c4] ss:$8 sps:$4 sm:$0xff]  }
 0x101   :  { %1412 = vmatprep.mubr.bf16.mxu1 %v3023_v40 }
 0x107   :  { %868 = vmatmul.mubr.bf16.gmra.mxu0 %v3025_v41 }
 0x108   :  { %1413 = vmatmul.mubr.bf16.gmra.mxu1 %v3025_v41  ;;  %877 = vmatprep.mubr.bf16.mxu0 %v3026_v42 }
 0x109   :  { %1422 = vmatprep.mubr.bf16.mxu1 %v3026_v42 }
 0x10f   :  { %878 = vmatmul.mubr.bf16.gmra.mxu0 %v3028_v43 }
 0x110   :  { %1423 = vmatmul.mubr.bf16.gmra.mxu1 %v3028_v43  ;;  %887 = vmatprep.mubr.bf16.mxu0 %v3029_v44 }
 0x111   :  { %1432 = vmatprep.mubr.bf16.mxu1 %v3029_v44 }
 0x117   :  { %888 = vmatmul.mubr.bf16.gmra.mxu0 %v3031_v45 }
 0x118   :  { %1433 = vmatmul.mubr.bf16.gmra.mxu1 %v3031_v45  ;;  %897 = vmatprep.mubr.bf16.mxu0 %v3032_v46 }
 0x119   :  { %1442 = vmatprep.mubr.bf16.mxu1 %v3032_v46 }
 0x11f   :  { %898 = vmatmul.mubr.bf16.gmra.mxu0 %v3034_v47 }
 0x120   :  { %1443 = vmatmul.mubr.bf16.gmra.mxu1 %v3034_v47  ;;  %907 = vmatprep.mubr.bf16.mxu0 %v3035_v48 }
 0x121   :  { %1452 = vmatprep.mubr.bf16.mxu1 %v3035_v48 }
 0x127   :  { %v669_v51 = vpop.f32.mrf.mxu0  ;;  %908 = vmatmul.mubr.bf16.gmra.mxu0 %v3037_v49 }
 0x128   :  { %v1214_v52 = vpop.f32.mrf.mxu1  ;;  %1453 = vmatmul.mubr.bf16.gmra.mxu1 %v3037_v49  ;;  %1533 = vst [vmem:[#allocation8] sm:$0xff] %v669_v51  ;;  %917 = vmatprep.mubr.bf16.mxu0 %v3038_v50 }
 0x129   :  { %v1661_v53 = vsub.f32 %v669_v51, %v1214_v52  ;;  %1462 = vmatprep.mubr.bf16.mxu1 %v3038_v50  ;;  %v671_v54 = vpop.f32.mrf.mxu0 }
 0x12a   :  { %v1216_v55 = vpop.f32.mrf.mxu1  ;;  %1534 = vst [vmem:[#allocation8 + $0x8] sm:$0xff] %v671_v54 }
 0x12b   :  { %v1662_v56 = vsub.f32 %v671_v54, %v1216_v55  ;;  %v673_v57 = vpop.f32.mrf.mxu0  ;;  %v1789_v60 = vmul.f32 %v1661_v53, %v1661_v53  ;;  %v3047_v55 = vld [vmem:[#allocation2 + $0x1c0] ss:$8 sps:$4 sm:$0xff]  }
 0x12c   :  { %v1218_v58 = vpop.f32.mrf.mxu1  ;;  %1535 = vst [vmem:[#allocation8 + $0x10] sm:$0xff] %v673_v57 }
 0x12d   :  { %v1790_v61 = vmul.f32 %v1662_v56, %v1662_v56  ;;  %v1663_v62 = vsub.f32 %v673_v57, %v1218_v58  ;;  %v675_v0 = vpop.f32.mrf.mxu0 }
 0x12e   :  { %v1220_v1 = vpop.f32.mrf.mxu1  ;;  %1536 = vst [vmem:[#allocation8 + $0x18] sm:$0xff] %v675_v0 }
 0x12f   :  { %v1664_v2 = vsub.f32 %v675_v0, %v1220_v1  ;;  %v1917_v3 = vadd.f32 %v1790_v61, %v1789_v60  ;;  %v679_v4 = vpop.f32.mrf.mxu0  ;;  %918 = vmatmul.mubr.bf16.gmra.mxu0 %v3040_v59  ;;  %v1791_v6 = vmul.f32 %v1663_v62, %v1663_v62 }
 0x130   :  { %v1224_v5 = vpop.f32.mrf.mxu1  ;;  %1463 = vmatmul.mubr.bf16.gmra.mxu1 %v3040_v59  ;;  %1537 = vst [vmem:[#allocation8 + $0x20] sm:$0xff] %v679_v4  ;;  %927 = vmatprep.mubr.bf16.mxu0 %v3041_v63  ;;  %v3052_v59 = vld [vmem:[#allocation2 + $0x1d4] ss:$8 sps:$4 sm:$0xff]  }
 0x131   :  { %v1792_v7 = vmul.f32 %v1664_v2, %v1664_v2  ;;  %v1665_v8 = vsub.f32 %v679_v4, %v1224_v5  ;;  %1918 = vadd.xlane.f32.xlu0 %v1917_v3  ;;  %v681_v9 = vpop.f32.mrf.mxu0  ;;  %1472 = vmatprep.mubr.bf16.mxu1 %v3041_v63 }
 0x132   :  { %v1226_v10 = vpop.f32.mrf.mxu1  ;;  %1538 = vst [vmem:[#allocation8 + $0x28] sm:$0xff] %v681_v9 }
 0x133   :  { %v1666_v11 = vsub.f32 %v681_v9, %v1226_v10  ;;  %v1920_v12 = vadd.f32 %v1792_v7, %v1791_v6  ;;  %v683_v13 = vpop.f32.mrf.mxu0  ;;  %v1793_v16 = vmul.f32 %v1665_v8, %v1665_v8 }
 0x134   :  { %v1228_v14 = vpop.f32.mrf.mxu1  ;;  %1539 = vst [vmem:[#allocation8 + $0x30] sm:$0xff] %v683_v13 }
 0x135   :  { %v1794_v17 = vmul.f32 %v1666_v11, %v1666_v11  ;;  %v1667_v18 = vsub.f32 %v683_v13, %v1228_v14  ;;  %1921 = vadd.xlane.f32.xlu0 %v1920_v12  ;;  %v685_v20 = vpop.f32.mrf.mxu0  ;;  %v3050_v11 = vld [vmem:[#allocation2 + $0x1d0] ss:$8 sps:$4 sm:$0xff]  }
 0x136   :  { %v1230_v21 = vpop.f32.mrf.mxu1  ;;  %1540 = vst [vmem:[#allocation8 + $0x38] sm:$0xff] %v685_v20 }
 0x137   :  { %v1668_v22 = vsub.f32 %v685_v20, %v1230_v21  ;;  %v1923_v23 = vadd.f32 %v1794_v17, %v1793_v16  ;;  %v689_v24 = vpop.f32.mrf.mxu0  ;;  %928 = vmatmul.mubr.bf16.gmra.mxu0 %v3043_v15  ;;  %v1795_v26 = vmul.f32 %v1667_v18, %v1667_v18 }
 0x138   :  { %v1234_v25 = vpop.f32.mrf.mxu1  ;;  %1473 = vmatmul.mubr.bf16.gmra.mxu1 %v3043_v15  ;;  %1541 = vst [vmem:[#allocation8 + $0x40] sm:$0xff] %v689_v24  ;;  %937 = vmatprep.mubr.bf16.mxu0 %v3044_v19  ;;  %v3055_v15 = vld [vmem:[#allocation2 + $0x1e4] ss:$8 sps:$4 sm:$0xff]  }
 0x139   :  { %v1796_v27 = vmul.f32 %v1668_v22, %v1668_v22  ;;  %v1669_v28 = vsub.f32 %v689_v24, %v1234_v25  ;;  %1924 = vadd.xlane.f32.xlu1 %v1923_v23  ;;  %v691_v29 = vpop.f32.mrf.mxu0  ;;  %1482 = vmatprep.mubr.bf16.mxu1 %v3044_v19 }
 0x13a   :  { %v1236_v30 = vpop.f32.mrf.mxu1  ;;  %1542 = vst [vmem:[#allocation8 + $0x48] sm:$0xff] %v691_v29 }
 0x13b   :  { %v1670_v31 = vsub.f32 %v691_v29, %v1236_v30  ;;  %v1926_v32 = vadd.f32 %v1796_v27, %v1795_v26  ;;  %v693_v33 = vpop.f32.mrf.mxu0  ;;  %v1797_v36 = vmul.f32 %v1669_v28, %v1669_v28 }
 0x13c   :  { %v1238_v34 = vpop.f32.mrf.mxu1  ;;  %1543 = vst [vmem:[#allocation8 + $0x50] sm:$0xff] %v693_v33 }
 0x13d   :  { %v1798_v37 = vmul.f32 %v1670_v31, %v1670_v31  ;;  %v1671_v38 = vsub.f32 %v693_v33, %v1238_v34  ;;  %1927 = vadd.xlane.f32.xlu1 %v1926_v32  ;;  %v695_v40 = vpop.f32.mrf.mxu0  ;;  %v3053_v31 = vld [vmem:[#allocation2 + $0x1e0] ss:$8 sps:$4 sm:$0xff]  }
 0x13e   :  { %v1240_v41 = vpop.f32.mrf.mxu1  ;;  %1544 = vst [vmem:[#allocation8 + $0x58] sm:$0xff] %v695_v40 }
 0x13f   :  { %v1672_v42 = vsub.f32 %v695_v40, %v1240_v41  ;;  %v1929_v43 = vadd.f32 %v1798_v37, %v1797_v36  ;;  %v699_v44 = vpop.f32.mrf.mxu0  ;;  %938 = vmatmul.mubr.bf16.gmra.mxu0 %v3046_v35  ;;  %v1799_v46 = vmul.f32 %v1671_v38, %v1671_v38 }
 0x140   :  { %v1244_v45 = vpop.f32.mrf.mxu1  ;;  %1483 = vmatmul.mubr.bf16.gmra.mxu1 %v3046_v35  ;;  %1545 = vst [vmem:[#allocation8 + $0x60] sm:$0xff] %v699_v44  ;;  %947 = vmatprep.mubr.bf16.mxu0 %v3049_v39  ;;  %v3058_v35 = vld [vmem:[#allocation2 + $0x1f4] ss:$8 sps:$4 sm:$0xff]  }
 0x141   :  { %v1800_v47 = vmul.f32 %v1672_v42, %v1672_v42  ;;  %v1673_v48 = vsub.f32 %v699_v44, %v1244_v45  ;;  %1930 = vadd.xlane.f32.xlu0 %v1929_v43  ;;  %v701_v49 = vpop.f32.mrf.mxu0  ;;  %1492 = vmatprep.mubr.bf16.mxu1 %v3049_v39 }
 0x142   :  { %v1246_v50 = vpop.f32.mrf.mxu1  ;;  %1546 = vst [vmem:[#allocation8 + $0x68] sm:$0xff] %v701_v49 }
 0x143   :  { %v1674_v51 = vsub.f32 %v701_v49, %v1246_v50  ;;  %v1932_v52 = vadd.f32 %v1800_v47, %v1799_v46  ;;  %v703_v53 = vpop.f32.mrf.mxu0  ;;  %v1801_v56 = vmul.f32 %v1673_v48, %v1673_v48 }
 0x144   :  { %v1248_v54 = vpop.f32.mrf.mxu1  ;;  %1547 = vst [vmem:[#allocation8 + $0x70] sm:$0xff] %v703_v53 }
 0x145   :  { %v1802_v57 = vmul.f32 %v1674_v51, %v1674_v51  ;;  %v1675_v58 = vsub.f32 %v703_v53, %v1248_v54  ;;  %1933 = vadd.xlane.f32.xlu1 %v1932_v52  ;;  %v705_v60 = vpop.f32.mrf.mxu0  ;;  %v3056_v51 = vld [vmem:[#allocation2 + $0x1f0] ss:$8 sps:$4 sm:$0xff]  }
 0x146   :  { %v1250_v61 = vpop.f32.mrf.mxu1  ;;  %1548 = vst [vmem:[#allocation8 + $0x78] sm:$0xff] %v705_v60 }
 0x147   :  { %v1676_v62 = vsub.f32 %v705_v60, %v1250_v61  ;;  %v1935_v63 = vadd.f32 %v1802_v57, %v1801_v56  ;;  %v709_v0 = vpop.f32.mrf.mxu0  ;;  %948 = vmatmul.mubr.bf16.gmra.mxu0 %v3047_v55  ;;  %v1803_v2 = vmul.f32 %v1675_v58, %v1675_v58 }
 0x148   :  { %v1254_v1 = vpop.f32.mrf.mxu1  ;;  %1493 = vmatmul.mubr.bf16.gmra.mxu1 %v3047_v55  ;;  %1549 = vst [vmem:[#allocation8 + $0x80] sm:$0xff] %v709_v0  ;;  %957 = vmatprep.mubr.bf16.mxu0 %v3052_v59 }
 0x149   :  { %v1804_v3 = vmul.f32 %v1676_v62, %v1676_v62  ;;  %v1677_v4 = vsub.f32 %v709_v0, %v1254_v1  ;;  %1936 = vadd.xlane.f32.xlu0 %v1935_v63  ;;  %v711_v5 = vpop.f32.mrf.mxu0  ;;  %1502 = vmatprep.mubr.bf16.mxu1 %v3052_v59 }
 0x14a   :  { %v1256_v6 = vpop.f32.mrf.mxu1  ;;  %1550 = vst [vmem:[#allocation8 + $0x88] sm:$0xff] %v711_v5 }
 0x14b   :  { %v1678_v7 = vsub.f32 %v711_v5, %v1256_v6  ;;  %v1938_v8 = vadd.f32 %v1804_v3, %v1803_v2  ;;  %v713_v9 = vpop.f32.mrf.mxu0  ;;  %v1805_v12 = vmul.f32 %v1677_v4, %v1677_v4 }
 0x14c   :  { %v1258_v10 = vpop.f32.mrf.mxu1  ;;  %1551 = vst [vmem:[#allocation8 + $0x90] sm:$0xff] %v713_v9 }
 0x14d   :  { %v1806_v13 = vmul.f32 %v1678_v7, %v1678_v7  ;;  %v1679_v14 = vsub.f32 %v713_v9, %v1258_v10  ;;  %1939 = vadd.xlane.f32.xlu1 %v1938_v8  ;;  %v715_v16 = vpop.f32.mrf.mxu0 }
 0x14e   :  { %v1260_v17 = vpop.f32.mrf.mxu1  ;;  %1552 = vst [vmem:[#allocation8 + $0x98] sm:$0xff] %v715_v16 }
 0x14f   :  { %v1680_v18 = vsub.f32 %v715_v16, %v1260_v17  ;;  %v1941_v19 = vadd.f32 %v1806_v13, %v1805_v12  ;;  %v719_v20 = vpop.f32.mrf.mxu0  ;;  %958 = vmatmul.mubr.bf16.gmra.mxu0 %v3050_v11  ;;  %v1807_v22 = vmul.f32 %v1679_v14, %v1679_v14 }
 0x150   :  { %v1264_v21 = vpop.f32.mrf.mxu1  ;;  %1503 = vmatmul.mubr.bf16.gmra.mxu1 %v3050_v11  ;;  %1553 = vst [vmem:[#allocation8 + $0xa0] sm:$0xff] %v719_v20  ;;  %967 = vmatprep.mubr.bf16.mxu0 %v3055_v15 }
 0x151   :  { %v1808_v23 = vmul.f32 %v1680_v18, %v1680_v18  ;;  %v1681_v24 = vsub.f32 %v719_v20, %v1264_v21  ;;  %1942 = vadd.xlane.f32.xlu0 %v1941_v19  ;;  %v721_v25 = vpop.f32.mrf.mxu0  ;;  %1512 = vmatprep.mubr.bf16.mxu1 %v3055_v15 }
 0x152   :  { %v1266_v26 = vpop.f32.mrf.mxu1  ;;  %1554 = vst [vmem:[#allocation8 + $0xa8] sm:$0xff] %v721_v25 }
 0x153   :  { %v1682_v27 = vsub.f32 %v721_v25, %v1266_v26  ;;  %v1944_v28 = vadd.f32 %v1808_v23, %v1807_v22  ;;  %v723_v29 = vpop.f32.mrf.mxu0  ;;  %v1809_v32 = vmul.f32 %v1681_v24, %v1681_v24 }
 0x154   :  { %v1268_v30 = vpop.f32.mrf.mxu1  ;;  %1555 = vst [vmem:[#allocation8 + $0xb0] sm:$0xff] %v723_v29 }
 0x155   :  { %v1810_v33 = vmul.f32 %v1682_v27, %v1682_v27  ;;  %v1683_v34 = vsub.f32 %v723_v29, %v1268_v30  ;;  %1945 = vadd.xlane.f32.xlu1 %v1944_v28  ;;  %v725_v36 = vpop.f32.mrf.mxu0 }
 0x156   :  { %v1270_v37 = vpop.f32.mrf.mxu1  ;;  %1556 = vst [vmem:[#allocation8 + $0xb8] sm:$0xff] %v725_v36 }
 0x157   :  { %v1684_v38 = vsub.f32 %v725_v36, %v1270_v37  ;;  %v1947_v39 = vadd.f32 %v1810_v33, %v1809_v32  ;;  %v729_v40 = vpop.f32.mrf.mxu0  ;;  %968 = vmatmul.mubr.bf16.gmra.mxu0 %v3053_v31  ;;  %v1811_v42 = vmul.f32 %v1683_v34, %v1683_v34 }
 0x158   :  { %v1274_v41 = vpop.f32.mrf.mxu1  ;;  %1513 = vmatmul.mubr.bf16.gmra.mxu1 %v3053_v31  ;;  %1557 = vst [vmem:[#allocation8 + $0xc0] sm:$0xff] %v729_v40  ;;  %977 = vmatprep.mubr.bf16.mxu0 %v3058_v35 }
 0x159   :  { %v1812_v43 = vmul.f32 %v1684_v38, %v1684_v38  ;;  %v1685_v44 = vsub.f32 %v729_v40, %v1274_v41  ;;  %1948 = vadd.xlane.f32.xlu0 %v1947_v39  ;;  %v731_v45 = vpop.f32.mrf.mxu0  ;;  %1522 = vmatprep.mubr.bf16.mxu1 %v3058_v35 }
 0x15a   :  { %v1276_v46 = vpop.f32.mrf.mxu1  ;;  %1558 = vst [vmem:[#allocation8 + $0xc8] sm:$0xff] %v731_v45 }
 0x15b   :  { %v1686_v47 = vsub.f32 %v731_v45, %v1276_v46  ;;  %v1950_v48 = vadd.f32 %v1812_v43, %v1811_v42  ;;  %v733_v49 = vpop.f32.mrf.mxu0  ;;  %v1813_v52 = vmul.f32 %v1685_v44, %v1685_v44 }
 0x15c   :  { %v1278_v50 = vpop.f32.mrf.mxu1  ;;  %1559 = vst [vmem:[#allocation8 + $0xd0] sm:$0xff] %v733_v49 }
 0x15d   :  { %v1814_v53 = vmul.f32 %v1686_v47, %v1686_v47  ;;  %v1687_v54 = vsub.f32 %v733_v49, %v1278_v50  ;;  %1951 = vadd.xlane.f32.xlu1 %v1950_v48  ;;  %v735_v55 = vpop.f32.mrf.mxu0 }
 0x15e   :  { %v1280_v56 = vpop.f32.mrf.mxu1  ;;  %1560 = vst [vmem:[#allocation8 + $0xd8] sm:$0xff] %v735_v55 }
 0x15f   :  { %v1688_v57 = vsub.f32 %v735_v55, %v1280_v56  ;;  %v1953_v58 = vadd.f32 %v1814_v53, %v1813_v52  ;;  %v739_v59 = vpop.f32.mrf.mxu0  ;;  %978 = vmatmul.mubr.bf16.gmra.mxu0 %v3056_v51  ;;  %v1815_v61 = vmul.f32 %v1687_v54, %v1687_v54 }
 0x160   :  { %v1284_v60 = vpop.f32.mrf.mxu1  ;;  %1523 = vmatmul.mubr.bf16.gmra.mxu1 %v3056_v51  ;;  %1561 = vst [vmem:[#allocation8 + $0xe0] sm:$0xff] %v739_v59 }
 0x161   :  { %v1816_v62 = vmul.f32 %v1688_v57, %v1688_v57  ;;  %v1689_v63 = vsub.f32 %v739_v59, %v1284_v60  ;;  %1954 = vadd.xlane.f32.xlu0 %v1953_v58  ;;  %v741_v0 = vpop.f32.mrf.mxu0 }
 0x162   :  { %v1286_v1 = vpop.f32.mrf.mxu1  ;;  %1562 = vst [vmem:[#allocation8 + $0xe8] sm:$0xff] %v741_v0 }
 0x163   :  { %v1690_v2 = vsub.f32 %v741_v0, %v1286_v1  ;;  %v1956_v3 = vadd.f32 %v1816_v62, %v1815_v61  ;;  %v743_v4 = vpop.f32.mrf.mxu0  ;;  %v1817_v6 = vmul.f32 %v1689_v63, %v1689_v63 }
 0x164   :  { %v1288_v5 = vpop.f32.mrf.mxu1  ;;  %1563 = vst [vmem:[#allocation8 + $0xf0] sm:$0xff] %v743_v4 }
 0x165   :  { %v1818_v7 = vmul.f32 %v1690_v2, %v1690_v2  ;;  %v1691_v8 = vsub.f32 %v743_v4, %v1288_v5  ;;  %1957 = vadd.xlane.f32.xlu1 %v1956_v3  ;;  %v745_v9 = vpop.f32.mrf.mxu0 }
 0x166   :  { %v1290_v10 = vpop.f32.mrf.mxu1  ;;  %1564 = vst [vmem:[#allocation8 + $0xf8] sm:$0xff] %v745_v9 }
 0x167   :  { %v1692_v11 = vsub.f32 %v745_v9, %v1290_v10  ;;  %v1959_v12 = vadd.f32 %v1818_v7, %v1817_v6  ;;  %v749_v13 = vpop.f32.mrf.mxu0  ;;  %v1819_v15 = vmul.f32 %v1691_v8, %v1691_v8 }
 0x168   :  { %v1294_v14 = vpop.f32.mrf.mxu1  ;;  %1565 = vst [vmem:[#allocation8 + $0x100] sm:$0xff] %v749_v13 }
 0x169   :  { %v1820_v16 = vmul.f32 %v1692_v11, %v1692_v11  ;;  %v1693_v17 = vsub.f32 %v749_v13, %v1294_v14  ;;  %1960 = vadd.xlane.f32.xlu0 %v1959_v12  ;;  %v751_v18 = vpop.f32.mrf.mxu0 }
 0x16a   :  { %v1296_v19 = vpop.f32.mrf.mxu1  ;;  %1566 = vst [vmem:[#allocation8 + $0x108] sm:$0xff] %v751_v18 }
 0x16b   :  { %v1694_v20 = vsub.f32 %v751_v18, %v1296_v19  ;;  %v1962_v21 = vadd.f32 %v1820_v16, %v1819_v15  ;;  %v753_v22 = vpop.f32.mrf.mxu0  ;;  %v1821_v24 = vmul.f32 %v1693_v17, %v1693_v17 }
 0x16c   :  { %v1298_v23 = vpop.f32.mrf.mxu1  ;;  %1567 = vst [vmem:[#allocation8 + $0x110] sm:$0xff] %v753_v22 }
 0x16d   :  { %v1822_v25 = vmul.f32 %v1694_v20, %v1694_v20  ;;  %v1695_v26 = vsub.f32 %v753_v22, %v1298_v23  ;;  %1963 = vadd.xlane.f32.xlu1 %v1962_v21  ;;  %v755_v27 = vpop.f32.mrf.mxu0 }
 0x16e   :  { %v1300_v28 = vpop.f32.mrf.mxu1  ;;  %1568 = vst [vmem:[#allocation8 + $0x118] sm:$0xff] %v755_v27 }
 0x16f   :  { %v1696_v29 = vsub.f32 %v755_v27, %v1300_v28  ;;  %v1965_v30 = vadd.f32 %v1822_v25, %v1821_v24  ;;  %v759_v31 = vpop.f32.mrf.mxu0  ;;  %v1823_v33 = vmul.f32 %v1695_v26, %v1695_v26 }
 0x170   :  { %v1304_v32 = vpop.f32.mrf.mxu1  ;;  %1569 = vst [vmem:[#allocation8 + $0x120] sm:$0xff] %v759_v31 }
 0x171   :  { %v1824_v34 = vmul.f32 %v1696_v29, %v1696_v29  ;;  %v1697_v35 = vsub.f32 %v759_v31, %v1304_v32  ;;  %1966 = vadd.xlane.f32.xlu0 %v1965_v30  ;;  %v761_v36 = vpop.f32.mrf.mxu0 }
 0x172   :  { %v1306_v37 = vpop.f32.mrf.mxu1  ;;  %1570 = vst [vmem:[#allocation8 + $0x128] sm:$0xff] %v761_v36 }
 0x173   :  { %v1698_v38 = vsub.f32 %v761_v36, %v1306_v37  ;;  %v1968_v39 = vadd.f32 %v1824_v34, %v1823_v33  ;;  %v763_v40 = vpop.f32.mrf.mxu0  ;;  %v1825_v42 = vmul.f32 %v1697_v35, %v1697_v35 }
 0x174   :  { %v1308_v41 = vpop.f32.mrf.mxu1  ;;  %1571 = vst [vmem:[#allocation8 + $0x130] sm:$0xff] %v763_v40 }
 0x175   :  { %v1826_v43 = vmul.f32 %v1698_v38, %v1698_v38  ;;  %v1699_v44 = vsub.f32 %v763_v40, %v1308_v41  ;;  %1969 = vadd.xlane.f32.xlu1 %v1968_v39  ;;  %v765_v45 = vpop.f32.mrf.mxu0 }
 0x176   :  { %v1310_v46 = vpop.f32.mrf.mxu1  ;;  %1572 = vst [vmem:[#allocation8 + $0x138] sm:$0xff] %v765_v45 }
 0x177   :  { %v1700_v47 = vsub.f32 %v765_v45, %v1310_v46  ;;  %v1971_v48 = vadd.f32 %v1826_v43, %v1825_v42  ;;  %v769_v49 = vpop.f32.mrf.mxu0  ;;  %v1827_v51 = vmul.f32 %v1699_v44, %v1699_v44 }
 0x178   :  { %v1314_v50 = vpop.f32.mrf.mxu1  ;;  %1573 = vst [vmem:[#allocation8 + $0x140] sm:$0xff] %v769_v49 }
 0x179   :  { %v1828_v52 = vmul.f32 %v1700_v47, %v1700_v47  ;;  %v1701_v53 = vsub.f32 %v769_v49, %v1314_v50  ;;  %1972 = vadd.xlane.f32.xlu0 %v1971_v48  ;;  %v771_v54 = vpop.f32.mrf.mxu0 }
 0x17a   :  { %v1316_v55 = vpop.f32.mrf.mxu1  ;;  %1574 = vst [vmem:[#allocation8 + $0x148] sm:$0xff] %v771_v54 }
 0x17b   :  { %v1702_v56 = vsub.f32 %v771_v54, %v1316_v55  ;;  %v1974_v57 = vadd.f32 %v1828_v52, %v1827_v51  ;;  %v773_v58 = vpop.f32.mrf.mxu0  ;;  %v1829_v60 = vmul.f32 %v1701_v53, %v1701_v53 }
 0x17c   :  { %v1318_v59 = vpop.f32.mrf.mxu1  ;;  %1575 = vst [vmem:[#allocation8 + $0x150] sm:$0xff] %v773_v58 }
 0x17d   :  { %v1830_v61 = vmul.f32 %v1702_v56, %v1702_v56  ;;  %v1703_v62 = vsub.f32 %v773_v58, %v1318_v59  ;;  %1975 = vadd.xlane.f32.xlu1 %v1974_v57  ;;  %v775_v63 = vpop.f32.mrf.mxu0 }
 0x17e   :  { %v1320_v0 = vpop.f32.mrf.mxu1  ;;  %1576 = vst [vmem:[#allocation8 + $0x158] sm:$0xff] %v775_v63 }
 0x17f   :  { %v1704_v1 = vsub.f32 %v775_v63, %v1320_v0  ;;  %v1977_v2 = vadd.f32 %v1830_v61, %v1829_v60  ;;  %v779_v3 = vpop.f32.mrf.mxu0  ;;  %v1831_v5 = vmul.f32 %v1703_v62, %v1703_v62 }
 0x180   :  { %v1324_v4 = vpop.f32.mrf.mxu1  ;;  %1577 = vst [vmem:[#allocation8 + $0x160] sm:$0xff] %v779_v3 }
 0x181   :  { %v1832_v6 = vmul.f32 %v1704_v1, %v1704_v1  ;;  %v1705_v7 = vsub.f32 %v779_v3, %v1324_v4  ;;  %1978 = vadd.xlane.f32.xlu0 %v1977_v2  ;;  %v781_v8 = vpop.f32.mrf.mxu0 }
 0x182   :  { %v1326_v9 = vpop.f32.mrf.mxu1  ;;  %1578 = vst [vmem:[#allocation8 + $0x168] sm:$0xff] %v781_v8 }
 0x183   :  { %v1706_v10 = vsub.f32 %v781_v8, %v1326_v9  ;;  %v1980_v11 = vadd.f32 %v1832_v6, %v1831_v5  ;;  %v783_v12 = vpop.f32.mrf.mxu0  ;;  %v1833_v14 = vmul.f32 %v1705_v7, %v1705_v7 }
 0x184   :  { %v1328_v13 = vpop.f32.mrf.mxu1  ;;  %1579 = vst [vmem:[#allocation8 + $0x170] sm:$0xff] %v783_v12 }
 0x185   :  { %v1834_v15 = vmul.f32 %v1706_v10, %v1706_v10  ;;  %v1707_v16 = vsub.f32 %v783_v12, %v1328_v13  ;;  %1981 = vadd.xlane.f32.xlu1 %v1980_v11  ;;  %v785_v17 = vpop.f32.mrf.mxu0 }
 0x186   :  { %v1330_v18 = vpop.f32.mrf.mxu1  ;;  %1580 = vst [vmem:[#allocation8 + $0x178] sm:$0xff] %v785_v17 }
 0x187   :  { %v1708_v19 = vsub.f32 %v785_v17, %v1330_v18  ;;  %v1983_v20 = vadd.f32 %v1834_v15, %v1833_v14  ;;  %v789_v21 = vpop.f32.mrf.mxu0  ;;  %v1835_v23 = vmul.f32 %v1707_v16, %v1707_v16 }
 0x188   :  { %v1334_v22 = vpop.f32.mrf.mxu1  ;;  %1581 = vst [vmem:[#allocation8 + $0x180] sm:$0xff] %v789_v21 }
 0x189   :  { %v1836_v24 = vmul.f32 %v1708_v19, %v1708_v19  ;;  %v1709_v25 = vsub.f32 %v789_v21, %v1334_v22  ;;  %1984 = vadd.xlane.f32.xlu0 %v1983_v20  ;;  %v791_v26 = vpop.f32.mrf.mxu0 }
 0x18a   :  { %v1336_v27 = vpop.f32.mrf.mxu1  ;;  %1582 = vst [vmem:[#allocation8 + $0x188] sm:$0xff] %v791_v26 }
 0x18b   :  { %v1710_v28 = vsub.f32 %v791_v26, %v1336_v27  ;;  %v1986_v29 = vadd.f32 %v1836_v24, %v1835_v23  ;;  %v793_v30 = vpop.f32.mrf.mxu0  ;;  %v1837_v32 = vmul.f32 %v1709_v25, %v1709_v25 }
 0x18c   :  { %v1338_v31 = vpop.f32.mrf.mxu1  ;;  %1583 = vst [vmem:[#allocation8 + $0x190] sm:$0xff] %v793_v30 }
 0x18d   :  { %v1838_v33 = vmul.f32 %v1710_v28, %v1710_v28  ;;  %v1711_v34 = vsub.f32 %v793_v30, %v1338_v31  ;;  %1987 = vadd.xlane.f32.xlu1 %v1986_v29  ;;  %v795_v35 = vpop.f32.mrf.mxu0 }
 0x18e   :  { %v1340_v36 = vpop.f32.mrf.mxu1  ;;  %1584 = vst [vmem:[#allocation8 + $0x198] sm:$0xff] %v795_v35 }
 0x18f   :  { %v1712_v37 = vsub.f32 %v795_v35, %v1340_v36  ;;  %v1989_v38 = vadd.f32 %v1838_v33, %v1837_v32  ;;  %v799_v39 = vpop.f32.mrf.mxu0  ;;  %v1839_v41 = vmul.f32 %v1711_v34, %v1711_v34 }
 0x190   :  { %v1344_v40 = vpop.f32.mrf.mxu1  ;;  %1585 = vst [vmem:[#allocation8 + $0x1a0] sm:$0xff] %v799_v39 }
 0x191   :  { %v1840_v42 = vmul.f32 %v1712_v37, %v1712_v37  ;;  %v1713_v43 = vsub.f32 %v799_v39, %v1344_v40  ;;  %1990 = vadd.xlane.f32.xlu0 %v1989_v38  ;;  %v801_v44 = vpop.f32.mrf.mxu0 }
 0x192   :  { %v1346_v45 = vpop.f32.mrf.mxu1  ;;  %1586 = vst [vmem:[#allocation8 + $0x1a8] sm:$0xff] %v801_v44 }
 0x193   :  { %v1714_v46 = vsub.f32 %v801_v44, %v1346_v45  ;;  %v1992_v47 = vadd.f32 %v1840_v42, %v1839_v41  ;;  %v803_v48 = vpop.f32.mrf.mxu0  ;;  %v1841_v50 = vmul.f32 %v1713_v43, %v1713_v43 }
 0x194   :  { %v1348_v49 = vpop.f32.mrf.mxu1  ;;  %1587 = vst [vmem:[#allocation8 + $0x1b0] sm:$0xff] %v803_v48 }
 0x195   :  { %v1842_v51 = vmul.f32 %v1714_v46, %v1714_v46  ;;  %v1715_v52 = vsub.f32 %v803_v48, %v1348_v49  ;;  %1993 = vadd.xlane.f32.xlu1 %v1992_v47  ;;  %v805_v53 = vpop.f32.mrf.mxu0 }
 0x196   :  { %v1350_v54 = vpop.f32.mrf.mxu1  ;;  %1588 = vst [vmem:[#allocation8 + $0x1b8] sm:$0xff] %v805_v53 }
 0x197   :  { %v1716_v55 = vsub.f32 %v805_v53, %v1350_v54  ;;  %v1995_v56 = vadd.f32 %v1842_v51, %v1841_v50  ;;  %v809_v57 = vpop.f32.mrf.mxu0  ;;  %v1843_v59 = vmul.f32 %v1715_v52, %v1715_v52 }
 0x198   :  { %v1354_v58 = vpop.f32.mrf.mxu1  ;;  %1589 = vst [vmem:[#allocation8 + $0x1c0] sm:$0xff] %v809_v57 }
 0x199   :  { %v1844_v60 = vmul.f32 %v1716_v55, %v1716_v55  ;;  %v1717_v61 = vsub.f32 %v809_v57, %v1354_v58  ;;  %1996 = vadd.xlane.f32.xlu0 %v1995_v56  ;;  %v811_v62 = vpop.f32.mrf.mxu0 }
 0x19a   :  { %v1356_v63 = vpop.f32.mrf.mxu1  ;;  %1590 = vst [vmem:[#allocation8 + $0x1c8] sm:$0xff] %v811_v62 }
 0x19b   :  { %v1718_v0 = vsub.f32 %v811_v62, %v1356_v63  ;;  %v1998_v1 = vadd.f32 %v1844_v60, %v1843_v59  ;;  %v813_v2 = vpop.f32.mrf.mxu0  ;;  %v1845_v4 = vmul.f32 %v1717_v61, %v1717_v61 }
 0x19c   :  { %v1358_v3 = vpop.f32.mrf.mxu1  ;;  %1591 = vst [vmem:[#allocation8 + $0x1d0] sm:$0xff] %v813_v2 }
 0x19d   :  { %v1846_v5 = vmul.f32 %v1718_v0, %v1718_v0  ;;  %v1719_v6 = vsub.f32 %v813_v2, %v1358_v3  ;;  %1999 = vadd.xlane.f32.xlu1 %v1998_v1  ;;  %v815_v7 = vpop.f32.mrf.mxu0 }
 0x19e   :  { %v1360_v8 = vpop.f32.mrf.mxu1  ;;  %1592 = vst [vmem:[#allocation8 + $0x1d8] sm:$0xff] %v815_v7 }
 0x19f   :  { %v1720_v9 = vsub.f32 %v815_v7, %v1360_v8  ;;  %v2001_v10 = vadd.f32 %v1846_v5, %v1845_v4  ;;  %v819_v11 = vpop.f32.mrf.mxu0  ;;  %v1847_v13 = vmul.f32 %v1719_v6, %v1719_v6 }
 0x1a0   :  { %v1364_v12 = vpop.f32.mrf.mxu1  ;;  %1593 = vst [vmem:[#allocation8 + $0x1e0] sm:$0xff] %v819_v11 }
 0x1a1   :  { %v1848_v14 = vmul.f32 %v1720_v9, %v1720_v9  ;;  %v1721_v15 = vsub.f32 %v819_v11, %v1364_v12  ;;  %2002 = vadd.xlane.f32.xlu0 %v2001_v10  ;;  %v821_v16 = vpop.f32.mrf.mxu0 }
 0x1a2   :  { %v1366_v17 = vpop.f32.mrf.mxu1  ;;  %1594 = vst [vmem:[#allocation8 + $0x1e8] sm:$0xff] %v821_v16 }
 0x1a3   :  { %v1722_v18 = vsub.f32 %v821_v16, %v1366_v17  ;;  %v2004_v19 = vadd.f32 %v1848_v14, %v1847_v13  ;;  %v823_v20 = vpop.f32.mrf.mxu0  ;;  %v1849_v22 = vmul.f32 %v1721_v15, %v1721_v15 }
 0x1a4   :  { %v1368_v21 = vpop.f32.mrf.mxu1  ;;  %1595 = vst [vmem:[#allocation8 + $0x1f0] sm:$0xff] %v823_v20 }
 0x1a5   :  { %v1850_v23 = vmul.f32 %v1722_v18, %v1722_v18  ;;  %v1723_v24 = vsub.f32 %v823_v20, %v1368_v21  ;;  %2005 = vadd.xlane.f32.xlu1 %v2004_v19  ;;  %v825_v25 = vpop.f32.mrf.mxu0 }
 0x1a6   :  { %v1370_v26 = vpop.f32.mrf.mxu1  ;;  %1596 = vst [vmem:[#allocation8 + $0x1f8] sm:$0xff] %v825_v25 }
 0x1a7   :  { %v1724_v27 = vsub.f32 %v825_v25, %v1370_v26  ;;  %v2007_v28 = vadd.f32 %v1850_v23, %v1849_v22  ;;  %v829_v29 = vpop.f32.mrf.mxu0  ;;  %v1851_v31 = vmul.f32 %v1723_v24, %v1723_v24 }
 0x1a8   :  { %v1374_v30 = vpop.f32.mrf.mxu1  ;;  %1597 = vst [vmem:[#allocation8 + $0x200] sm:$0xff] %v829_v29 }
 0x1a9   :  { %v1852_v32 = vmul.f32 %v1724_v27, %v1724_v27  ;;  %v1725_v33 = vsub.f32 %v829_v29, %v1374_v30  ;;  %2008 = vadd.xlane.f32.xlu0 %v2007_v28  ;;  %v831_v34 = vpop.f32.mrf.mxu0 }
 0x1aa   :  { %v1376_v35 = vpop.f32.mrf.mxu1  ;;  %1598 = vst [vmem:[#allocation8 + $0x208] sm:$0xff] %v831_v34 }
 0x1ab   :  { %v1726_v36 = vsub.f32 %v831_v34, %v1376_v35  ;;  %v2010_v37 = vadd.f32 %v1852_v32, %v1851_v31  ;;  %v833_v38 = vpop.f32.mrf.mxu0  ;;  %v1853_v40 = vmul.f32 %v1725_v33, %v1725_v33 }
 0x1ac   :  { %v1378_v39 = vpop.f32.mrf.mxu1  ;;  %1599 = vst [vmem:[#allocation8 + $0x210] sm:$0xff] %v833_v38 }
 0x1ad   :  { %v1854_v41 = vmul.f32 %v1726_v36, %v1726_v36  ;;  %v1727_v42 = vsub.f32 %v833_v38, %v1378_v39  ;;  %2011 = vadd.xlane.f32.xlu1 %v2010_v37  ;;  %v835_v43 = vpop.f32.mrf.mxu0 }
 0x1ae   :  { %v1380_v44 = vpop.f32.mrf.mxu1  ;;  %1600 = vst [vmem:[#allocation8 + $0x218] sm:$0xff] %v835_v43 }
 0x1af   :  { %v1728_v45 = vsub.f32 %v835_v43, %v1380_v44  ;;  %v2013_v46 = vadd.f32 %v1854_v41, %v1853_v40  ;;  %v839_v47 = vpop.f32.mrf.mxu0  ;;  %v1855_v49 = vmul.f32 %v1727_v42, %v1727_v42 }
 0x1b0   :  { %v1384_v48 = vpop.f32.mrf.mxu1  ;;  %1601 = vst [vmem:[#allocation8 + $0x220] sm:$0xff] %v839_v47 }
 0x1b1   :  { %v1856_v50 = vmul.f32 %v1728_v45, %v1728_v45  ;;  %v1729_v51 = vsub.f32 %v839_v47, %v1384_v48  ;;  %2014 = vadd.xlane.f32.xlu0 %v2013_v46  ;;  %v841_v52 = vpop.f32.mrf.mxu0 }
 0x1b2   :  { %v1386_v53 = vpop.f32.mrf.mxu1  ;;  %1602 = vst [vmem:[#allocation8 + $0x228] sm:$0xff] %v841_v52 }
 0x1b3   :  { %v1730_v54 = vsub.f32 %v841_v52, %v1386_v53  ;;  %v2016_v55 = vadd.f32 %v1856_v50, %v1855_v49  ;;  %v843_v56 = vpop.f32.mrf.mxu0  ;;  %v1857_v58 = vmul.f32 %v1729_v51, %v1729_v51 }
 0x1b4   :  { %v1388_v57 = vpop.f32.mrf.mxu1  ;;  %1603 = vst [vmem:[#allocation8 + $0x230] sm:$0xff] %v843_v56 }
 0x1b5   :  { %v1858_v59 = vmul.f32 %v1730_v54, %v1730_v54  ;;  %2017 = vadd.xlane.f32.xlu1 %v2016_v55  ;;  %v1731_v60 = vsub.f32 %v843_v56, %v1388_v57  ;;  %v845_v61 = vpop.f32.mrf.mxu0 }
 0x1b6   :  { %v1390_v62 = vpop.f32.mrf.mxu1  ;;  %1604 = vst [vmem:[#allocation8 + $0x238] sm:$0xff] %v845_v61 }
 0x1b7   :  { %v1732_v63 = vsub.f32 %v845_v61, %v1390_v62  ;;  %v2019_v0 = vadd.f32 %v1858_v59, %v1857_v58  ;;  %v849_v1 = vpop.f32.mrf.mxu0  ;;  %v1859_v4 = vmul.f32 %v1731_v60, %v1731_v60 }
 0x1b8   :  { %v1394_v2 = vpop.f32.mrf.mxu1  ;;  %1605 = vst [vmem:[#allocation8 + $0x240] sm:$0xff] %v849_v1 }
 0x1b9   :  { %v1860_v3 = vmul.f32 %v1732_v63, %v1732_v63  ;;  %2020 = vadd.xlane.f32.xlu0 %v2019_v0  ;;  %v1733_v5 = vsub.f32 %v849_v1, %v1394_v2  ;;  %v851_v7 = vpop.f32.mrf.mxu0 }
 0x1ba   :  { %v1396_v6 = vpop.f32.mrf.mxu1  ;;  %1606 = vst [vmem:[#allocation8 + $0x248] sm:$0xff] %v851_v7 }
 0x1bb   :  { %v1734_v8 = vsub.f32 %v851_v7, %v1396_v6  ;;  %v2022_v10 = vadd.f32 %v1860_v3, %v1859_v4  ;;  %v853_v11 = vpop.f32.mrf.mxu0  ;;  %v1861_v12 = vmul.f32 %v1733_v5, %v1733_v5 }
 0x1bc   :  { %v1398_v9 = vpop.f32.mrf.mxu1  ;;  %1607 = vst [vmem:[#allocation8 + $0x250] sm:$0xff] %v853_v11 }
 0x1bd   :  { %v1862_v13 = vmul.f32 %v1734_v8, %v1734_v8  ;;  %v1735_v14 = vsub.f32 %v853_v11, %v1398_v9  ;;  %2023 = vadd.xlane.f32.xlu1 %v2022_v10  ;;  %v855_v16 = vpop.f32.mrf.mxu0 }
 0x1be   :  { %v1400_v15 = vpop.f32.mrf.mxu1  ;;  %1608 = vst [vmem:[#allocation8 + $0x258] sm:$0xff] %v855_v16 }
 0x1bf   :  { %v1736_v17 = vsub.f32 %v855_v16, %v1400_v15  ;;  %v2025_v19 = vadd.f32 %v1862_v13, %v1861_v12  ;;  %v859_v20 = vpop.f32.mrf.mxu0  ;;  %v1863_v21 = vmul.f32 %v1735_v14, %v1735_v14 }
 0x1c0   :  { %v1404_v18 = vpop.f32.mrf.mxu1  ;;  %1609 = vst [vmem:[#allocation8 + $0x260] sm:$0xff] %v859_v20 }
 0x1c1   :  { %v1864_v22 = vmul.f32 %v1736_v17, %v1736_v17  ;;  %v1737_v23 = vsub.f32 %v859_v20, %v1404_v18  ;;  %2026 = vadd.xlane.f32.xlu0 %v2025_v19  ;;  %v861_v25 = vpop.f32.mrf.mxu0 }
 0x1c2   :  { %v1406_v24 = vpop.f32.mrf.mxu1  ;;  %1610 = vst [vmem:[#allocation8 + $0x268] sm:$0xff] %v861_v25 }
 0x1c3   :  { %v1738_v26 = vsub.f32 %v861_v25, %v1406_v24  ;;  %v2028_v28 = vadd.f32 %v1864_v22, %v1863_v21  ;;  %v863_v29 = vpop.f32.mrf.mxu0  ;;  %v1865_v30 = vmul.f32 %v1737_v23, %v1737_v23 }
 0x1c4   :  { %v1408_v27 = vpop.f32.mrf.mxu1  ;;  %1611 = vst [vmem:[#allocation8 + $0x270] sm:$0xff] %v863_v29 }
 0x1c5   :  { %v1866_v31 = vmul.f32 %v1738_v26, %v1738_v26  ;;  %2029 = vadd.xlane.f32.xlu1 %v2028_v28  ;;  %v1739_v33 = vsub.f32 %v863_v29, %v1408_v27  ;;  %v865_v34 = vpop.f32.mrf.mxu0 }
 0x1c6   :  { %v1410_v32 = vpop.f32.mrf.mxu1  ;;  %1612 = vst [vmem:[#allocation8 + $0x278] sm:$0xff] %v865_v34 }
 0x1c7   :  { %v1740_v35 = vsub.f32 %v865_v34, %v1410_v32  ;;  %v2031_v37 = vadd.f32 %v1866_v31, %v1865_v30  ;;  %v869_v38 = vpop.f32.mrf.mxu0  ;;  %v1867_v41 = vmul.f32 %v1739_v33, %v1739_v33 }
 0x1c8   :  { %v1414_v36 = vpop.f32.mrf.mxu1  ;;  %1613 = vst [vmem:[#allocation8 + $0x280] sm:$0xff] %v869_v38 }
 0x1c9   :  { %v1868_v39 = vmul.f32 %v1740_v35, %v1740_v35  ;;  %2032 = vadd.xlane.f32.xlu0 %v2031_v37  ;;  %v1741_v42 = vsub.f32 %v869_v38, %v1414_v36  ;;  %v871_v43 = vpop.f32.mrf.mxu0 }
 0x1ca   :  { %v1416_v40 = vpop.f32.mrf.mxu1  ;;  %1614 = vst [vmem:[#allocation8 + $0x288] sm:$0xff] %v871_v43 }
 0x1cb   :  { %v1742_v44 = vsub.f32 %v871_v43, %v1416_v40  ;;  %v873_v46 = vpop.f32.mrf.mxu0  ;;  %v2034_v47 = vadd.f32 %v1868_v39, %v1867_v41  ;;  %v1869_v50 = vmul.f32 %v1741_v42, %v1741_v42 }
 0x1cc   :  { %v1418_v45 = vpop.f32.mrf.mxu1  ;;  %1615 = vst [vmem:[#allocation8 + $0x290] sm:$0xff] %v873_v46 }
 0x1cd   :  { %v1870_v48 = vmul.f32 %v1742_v44, %v1742_v44  ;;  %v1743_v51 = vsub.f32 %v873_v46, %v1418_v45  ;;  %2035 = vadd.xlane.f32.xlu1 %v2034_v47  ;;  %v875_v52 = vpop.f32.mrf.mxu0 }
 0x1ce   :  { %v1420_v49 = vpop.f32.mrf.mxu1  ;;  %1616 = vst [vmem:[#allocation8 + $0x298] sm:$0xff] %v875_v52 }
 0x1cf   :  { %v1744_v53 = vsub.f32 %v875_v52, %v1420_v49  ;;  %v879_v55 = vpop.f32.mrf.mxu0  ;;  %v2037_v56 = vadd.f32 %v1870_v48, %v1869_v50  ;;  %v1871_v59 = vmul.f32 %v1743_v51, %v1743_v51 }
 0x1d0   :  { %v1424_v54 = vpop.f32.mrf.mxu1  ;;  %1617 = vst [vmem:[#allocation8 + $0x2a0] sm:$0xff] %v879_v55 }
 0x1d1   :  { %v1872_v57 = vmul.f32 %v1744_v53, %v1744_v53  ;;  %v1745_v60 = vsub.f32 %v879_v55, %v1424_v54  ;;  %2038 = vadd.xlane.f32.xlu0 %v2037_v56  ;;  %v881_v61 = vpop.f32.mrf.mxu0 }
 0x1d2   :  { %v1426_v58 = vpop.f32.mrf.mxu1  ;;  %1618 = vst [vmem:[#allocation8 + $0x2a8] sm:$0xff] %v881_v61 }
 0x1d3   :  { %v1746_v62 = vsub.f32 %v881_v61, %v1426_v58  ;;  %v883_v0 = vpop.f32.mrf.mxu0  ;;  %v2040_v1 = vadd.f32 %v1872_v57, %v1871_v59  ;;  %v1873_v4 = vmul.f32 %v1745_v60, %v1745_v60 }
 0x1d4   :  { %v1428_v63 = vpop.f32.mrf.mxu1  ;;  %1619 = vst [vmem:[#allocation8 + $0x2b0] sm:$0xff] %v883_v0 }
 0x1d5   :  { %v1874_v2 = vmul.f32 %v1746_v62, %v1746_v62  ;;  %v1747_v5 = vsub.f32 %v883_v0, %v1428_v63  ;;  %2041 = vadd.xlane.f32.xlu1 %v2040_v1  ;;  %v885_v6 = vpop.f32.mrf.mxu0 }
 0x1d6   :  { %v1430_v3 = vpop.f32.mrf.mxu1  ;;  %1620 = vst [vmem:[#allocation8 + $0x2b8] sm:$0xff] %v885_v6 }
 0x1d7   :  { %v1748_v7 = vsub.f32 %v885_v6, %v1430_v3  ;;  %v889_v9 = vpop.f32.mrf.mxu0  ;;  %v2043_v10 = vadd.f32 %v1874_v2, %v1873_v4  ;;  %v1875_v13 = vmul.f32 %v1747_v5, %v1747_v5 }
 0x1d8   :  { %v1434_v8 = vpop.f32.mrf.mxu1  ;;  %1621 = vst [vmem:[#allocation8 + $0x2c0] sm:$0xff] %v889_v9 }
 0x1d9   :  { %v1876_v11 = vmul.f32 %v1748_v7, %v1748_v7  ;;  %v1749_v14 = vsub.f32 %v889_v9, %v1434_v8  ;;  %2044 = vadd.xlane.f32.xlu0 %v2043_v10  ;;  %v891_v15 = vpop.f32.mrf.mxu0 }
 0x1da   :  { %v1436_v12 = vpop.f32.mrf.mxu1  ;;  %1622 = vst [vmem:[#allocation8 + $0x2c8] sm:$0xff] %v891_v15 }
 0x1db   :  { %v1750_v16 = vsub.f32 %v891_v15, %v1436_v12  ;;  %v893_v18 = vpop.f32.mrf.mxu0  ;;  %v2046_v19 = vadd.f32 %v1876_v11, %v1875_v13  ;;  %v1877_v22 = vmul.f32 %v1749_v14, %v1749_v14 }
 0x1dc   :  { %v1438_v17 = vpop.f32.mrf.mxu1  ;;  %1623 = vst [vmem:[#allocation8 + $0x2d0] sm:$0xff] %v893_v18 }
 0x1dd   :  { %v1878_v20 = vmul.f32 %v1750_v16, %v1750_v16  ;;  %v1751_v23 = vsub.f32 %v893_v18, %v1438_v17  ;;  %2047 = vadd.xlane.f32.xlu1 %v2046_v19  ;;  %v895_v24 = vpop.f32.mrf.mxu0 }
 0x1de   :  { %v1440_v21 = vpop.f32.mrf.mxu1  ;;  %1624 = vst [vmem:[#allocation8 + $0x2d8] sm:$0xff] %v895_v24 }
 0x1df   :  { %v1752_v25 = vsub.f32 %v895_v24, %v1440_v21  ;;  %v899_v27 = vpop.f32.mrf.mxu0  ;;  %v2049_v28 = vadd.f32 %v1878_v20, %v1877_v22  ;;  %v1879_v31 = vmul.f32 %v1751_v23, %v1751_v23 }
 0x1e0   :  { %v1444_v26 = vpop.f32.mrf.mxu1  ;;  %1625 = vst [vmem:[#allocation8 + $0x2e0] sm:$0xff] %v899_v27 }
 0x1e1   :  { %v1880_v29 = vmul.f32 %v1752_v25, %v1752_v25  ;;  %v1753_v32 = vsub.f32 %v899_v27, %v1444_v26  ;;  %2050 = vadd.xlane.f32.xlu0 %v2049_v28  ;;  %v901_v33 = vpop.f32.mrf.mxu0 }
 0x1e2   :  { %v1446_v30 = vpop.f32.mrf.mxu1  ;;  %1626 = vst [vmem:[#allocation8 + $0x2e8] sm:$0xff] %v901_v33 }
 0x1e3   :  { %v1754_v34 = vsub.f32 %v901_v33, %v1446_v30  ;;  %v903_v36 = vpop.f32.mrf.mxu0  ;;  %v2052_v37 = vadd.f32 %v1880_v29, %v1879_v31  ;;  %v1881_v40 = vmul.f32 %v1753_v32, %v1753_v32 }
 0x1e4   :  { %v1448_v35 = vpop.f32.mrf.mxu1  ;;  %1627 = vst [vmem:[#allocation8 + $0x2f0] sm:$0xff] %v903_v36 }
 0x1e5   :  { %v1882_v38 = vmul.f32 %v1754_v34, %v1754_v34  ;;  %v1755_v41 = vsub.f32 %v903_v36, %v1448_v35  ;;  %2053 = vadd.xlane.f32.xlu1 %v2052_v37  ;;  %v905_v42 = vpop.f32.mrf.mxu0 }
 0x1e6   :  { %v1450_v39 = vpop.f32.mrf.mxu1  ;;  %1628 = vst [vmem:[#allocation8 + $0x2f8] sm:$0xff] %v905_v42 }
 0x1e7   :  { %v1756_v43 = vsub.f32 %v905_v42, %v1450_v39  ;;  %v909_v45 = vpop.f32.mrf.mxu0  ;;  %v2055_v46 = vadd.f32 %v1882_v38, %v1881_v40  ;;  %v1883_v49 = vmul.f32 %v1755_v41, %v1755_v41 }
 0x1e8   :  { %v1454_v44 = vpop.f32.mrf.mxu1  ;;  %1629 = vst [vmem:[#allocation8 + $0x300] sm:$0xff] %v909_v45 }
 0x1e9   :  { %v1884_v47 = vmul.f32 %v1756_v43, %v1756_v43  ;;  %v1757_v50 = vsub.f32 %v909_v45, %v1454_v44  ;;  %2056 = vadd.xlane.f32.xlu0 %v2055_v46  ;;  %v911_v51 = vpop.f32.mrf.mxu0 }
 0x1ea   :  { %v1456_v48 = vpop.f32.mrf.mxu1  ;;  %1630 = vst [vmem:[#allocation8 + $0x308] sm:$0xff] %v911_v51 }
 0x1eb   :  { %v1758_v52 = vsub.f32 %v911_v51, %v1456_v48  ;;  %v913_v54 = vpop.f32.mrf.mxu0  ;;  %v2058_v55 = vadd.f32 %v1884_v47, %v1883_v49  ;;  %v1885_v58 = vmul.f32 %v1757_v50, %v1757_v50 }
 0x1ec   :  { %v1458_v53 = vpop.f32.mrf.mxu1  ;;  %1631 = vst [vmem:[#allocation8 + $0x310] sm:$0xff] %v913_v54 }
 0x1ed   :  { %v1886_v56 = vmul.f32 %v1758_v52, %v1758_v52  ;;  %v1759_v59 = vsub.f32 %v913_v54, %v1458_v53  ;;  %2059 = vadd.xlane.f32.xlu1 %v2058_v55  ;;  %v915_v60 = vpop.f32.mrf.mxu0 }
 0x1ee   :  { %v1460_v57 = vpop.f32.mrf.mxu1  ;;  %1632 = vst [vmem:[#allocation8 + $0x318] sm:$0xff] %v915_v60 }
 0x1ef   :  { %v1760_v61 = vsub.f32 %v915_v60, %v1460_v57  ;;  %v919_v63 = vpop.f32.mrf.mxu0  ;;  %v2061_v0 = vadd.f32 %v1886_v56, %v1885_v58  ;;  %v1887_v3 = vmul.f32 %v1759_v59, %v1759_v59 }
 0x1f0   :  { %v1464_v62 = vpop.f32.mrf.mxu1  ;;  %1633 = vst [vmem:[#allocation8 + $0x320] sm:$0xff] %v919_v63 }
 0x1f1   :  { %v1888_v1 = vmul.f32 %v1760_v61, %v1760_v61  ;;  %v1761_v4 = vsub.f32 %v919_v63, %v1464_v62  ;;  %2062 = vadd.xlane.f32.xlu0 %v2061_v0  ;;  %v921_v5 = vpop.f32.mrf.mxu0 }
 0x1f2   :  { %v1466_v2 = vpop.f32.mrf.mxu1  ;;  %1634 = vst [vmem:[#allocation8 + $0x328] sm:$0xff] %v921_v5 }
 0x1f3   :  { %v1762_v6 = vsub.f32 %v921_v5, %v1466_v2  ;;  %v923_v8 = vpop.f32.mrf.mxu0  ;;  %v2064_v9 = vadd.f32 %v1888_v1, %v1887_v3  ;;  %v1889_v12 = vmul.f32 %v1761_v4, %v1761_v4 }
 0x1f4   :  { %v1468_v7 = vpop.f32.mrf.mxu1  ;;  %1635 = vst [vmem:[#allocation8 + $0x330] sm:$0xff] %v923_v8 }
 0x1f5   :  { %v1890_v10 = vmul.f32 %v1762_v6, %v1762_v6  ;;  %v1763_v13 = vsub.f32 %v923_v8, %v1468_v7  ;;  %2065 = vadd.xlane.f32.xlu1 %v2064_v9  ;;  %v925_v14 = vpop.f32.mrf.mxu0 }
 0x1f6   :  { %v1470_v11 = vpop.f32.mrf.mxu1  ;;  %1636 = vst [vmem:[#allocation8 + $0x338] sm:$0xff] %v925_v14 }
 0x1f7   :  { %v1764_v15 = vsub.f32 %v925_v14, %v1470_v11  ;;  %v929_v17 = vpop.f32.mrf.mxu0  ;;  %v2067_v18 = vadd.f32 %v1890_v10, %v1889_v12  ;;  %v1891_v21 = vmul.f32 %v1763_v13, %v1763_v13 }
 0x1f8   :  { %v1474_v16 = vpop.f32.mrf.mxu1  ;;  %1637 = vst [vmem:[#allocation8 + $0x340] sm:$0xff] %v929_v17 }
 0x1f9   :  { %v1892_v19 = vmul.f32 %v1764_v15, %v1764_v15  ;;  %v1765_v22 = vsub.f32 %v929_v17, %v1474_v16  ;;  %2068 = vadd.xlane.f32.xlu0 %v2067_v18  ;;  %v931_v23 = vpop.f32.mrf.mxu0 }
 0x1fa   :  { %v1476_v20 = vpop.f32.mrf.mxu1  ;;  %1638 = vst [vmem:[#allocation8 + $0x348] sm:$0xff] %v931_v23 }
 0x1fb   :  { %v1766_v24 = vsub.f32 %v931_v23, %v1476_v20  ;;  %v933_v26 = vpop.f32.mrf.mxu0  ;;  %v2070_v27 = vadd.f32 %v1892_v19, %v1891_v21  ;;  %v1893_v30 = vmul.f32 %v1765_v22, %v1765_v22 }
 0x1fc   :  { %v1478_v25 = vpop.f32.mrf.mxu1  ;;  %1639 = vst [vmem:[#allocation8 + $0x350] sm:$0xff] %v933_v26 }
 0x1fd   :  { %v1894_v28 = vmul.f32 %v1766_v24, %v1766_v24  ;;  %v1767_v31 = vsub.f32 %v933_v26, %v1478_v25  ;;  %2071 = vadd.xlane.f32.xlu1 %v2070_v27  ;;  %v935_v32 = vpop.f32.mrf.mxu0 }
 0x1fe   :  { %v1480_v29 = vpop.f32.mrf.mxu1  ;;  %1640 = vst [vmem:[#allocation8 + $0x358] sm:$0xff] %v935_v32 }
 0x1ff   :  { %v1768_v33 = vsub.f32 %v935_v32, %v1480_v29  ;;  %v939_v35 = vpop.f32.mrf.mxu0  ;;  %v2073_v36 = vadd.f32 %v1894_v28, %v1893_v30  ;;  %v1895_v39 = vmul.f32 %v1767_v31, %v1767_v31  ;;  %v3338_v29 = vpop.xlane.xlu0 %1918 }
 0x200   :  { %v1484_v34 = vpop.f32.mrf.mxu1  ;;  %1641 = vst [vmem:[#allocation8 + $0x360] sm:$0xff] %v939_v35  ;;  %vm2111_vm2 = vcmp.eq.f32.partialorder %v3338_v29, inf  ;;  %vm2113_vm3 = vcmp.eq.f32.partialorder %v3338_v29, 0.0 }
 0x201   :  { %v1896_v37 = vmul.f32 %v1768_v33, %v1768_v33  ;;  %v1769_v40 = vsub.f32 %v939_v35, %v1484_v34  ;;  %2074 = vadd.xlane.f32.xlu0 %v2073_v36  ;;  %v941_v41 = vpop.f32.mrf.mxu0 }
 0x202   :  { %v1486_v38 = vpop.f32.mrf.mxu1  ;;  %1642 = vst [vmem:[#allocation8 + $0x368] sm:$0xff] %v941_v41 }
 0x203   :  { %v1770_v42 = vsub.f32 %v941_v41, %v1486_v38  ;;  %v943_v44 = vpop.f32.mrf.mxu0  ;;  %v2076_v45 = vadd.f32 %v1896_v37, %v1895_v39  ;;  %v1897_v48 = vmul.f32 %v1769_v40, %v1769_v40 }
 0x204   :  { %v1488_v43 = vpop.f32.mrf.mxu1  ;;  %1643 = vst [vmem:[#allocation8 + $0x370] sm:$0xff] %v943_v44 }
 0x205   :  { %v1898_v46 = vmul.f32 %v1770_v42, %v1770_v42  ;;  %v1771_v49 = vsub.f32 %v943_v44, %v1488_v43  ;;  %2077 = vadd.xlane.f32.xlu1 %v2076_v45  ;;  %v945_v50 = vpop.f32.mrf.mxu0  ;;  %v3340_v42 = vpop.xlane.xlu1 %1924 }
 0x206   :  { %v1490_v47 = vpop.f32.mrf.mxu1  ;;  %1644 = vst [vmem:[#allocation8 + $0x378] sm:$0xff] %v945_v50  ;;  %v3342_v45 = vpop.xlane.xlu0 %1921  ;;  %vm2125_vm5 = vcmp.eq.f32.partialorder %v3340_v42, inf  ;;  %vm2127_vm6 = vcmp.eq.f32.partialorder %v3340_v42, 0.0 }
 0x207   :  { %v1772_v51 = vsub.f32 %v945_v50, %v1490_v47  ;;  %v949_v53 = vpop.f32.mrf.mxu0  ;;  %v2079_v54 = vadd.f32 %v1898_v46, %v1897_v48  ;;  %v1899_v57 = vmul.f32 %v1771_v49, %v1771_v49  ;;  %3059 = vrsqrt.f32 %v3342_v45 }
 0x208   :  { %v1494_v52 = vpop.f32.mrf.mxu1  ;;  %1645 = vst [vmem:[#allocation8 + $0x380] sm:$0xff] %v949_v53  ;;  %3061 = vrsqrt.f32 %v3338_v29  ;;  %vm2118_vm0 = vcmp.eq.f32.partialorder %v3342_v45, inf  ;;  %vm2120_vm4 = vcmp.eq.f32.partialorder %v3342_v45, 0.0 }
 0x209   :  { %v1900_v55 = vmul.f32 %v1772_v51, %v1772_v51  ;;  %v1773_v58 = vsub.f32 %v949_v53, %v1494_v52  ;;  %2080 = vadd.xlane.f32.xlu0 %v2079_v54  ;;  %v951_v59 = vpop.f32.mrf.mxu0  ;;  %3063 = vrsqrt.f32 %v3340_v42 }
 0x20a   :  { %v1496_v56 = vpop.f32.mrf.mxu1  ;;  %1646 = vst [vmem:[#allocation8 + $0x388] sm:$0xff] %v951_v59 }
 0x20b   :  { %v1774_v60 = vsub.f32 %v951_v59, %v1496_v56  ;;  %v953_v62 = vpop.f32.mrf.mxu0  ;;  %v2082_v63 = vadd.f32 %v1900_v55, %v1899_v57  ;;  %v1901_v2 = vmul.f32 %v1773_v58, %v1773_v58  ;;  %v3346_v57 = vpop.xlane.xlu1 %1927 }
 0x20c   :  { %v1498_v61 = vpop.f32.mrf.mxu1  ;;  %1647 = vst [vmem:[#allocation8 + $0x390] sm:$0xff] %v953_v62  ;;  %3065 = vrsqrt.f32 %v3346_v57  ;;  %vm2132_vm7 = vcmp.eq.f32.partialorder %v3346_v57, inf  ;;  %vm2134_vm8 = vcmp.eq.f32.partialorder %v3346_v57, 0.0 }
 0x20d   :  { %v1902_v0 = vmul.f32 %v1774_v60, %v1774_v60  ;;  %v1775_v3 = vsub.f32 %v953_v62, %v1498_v61  ;;  %2083 = vadd.xlane.f32.xlu1 %v2082_v63  ;;  %v955_v4 = vpop.f32.mrf.mxu0  ;;  %v3349_v63 = vpop.xlane.xlu0 %1930 }
 0x20e   :  { %v1500_v1 = vpop.f32.mrf.mxu1  ;;  %1648 = vst [vmem:[#allocation8 + $0x398] sm:$0xff] %v955_v4  ;;  %3067 = vrsqrt.f32 %v3349_v63  ;;  %vm2139_vm9 = vcmp.eq.f32.partialorder %v3349_v63, inf  ;;  %vm2141_vm10 = vcmp.eq.f32.partialorder %v3349_v63, 0.0 }
 0x20f   :  { %v1776_v5 = vsub.f32 %v955_v4, %v1500_v1  ;;  %v959_v7 = vpop.f32.mrf.mxu0  ;;  %v2085_v8 = vadd.f32 %v1902_v0, %v1901_v2  ;;  %v1903_v11 = vmul.f32 %v1775_v3, %v1775_v3  ;;  %v3352_v2 = vpop.xlane.xlu1 %1933 }
 0x210   :  { %v1504_v6 = vpop.f32.mrf.mxu1  ;;  %1649 = vst [vmem:[#allocation8 + $0x3a0] sm:$0xff] %v959_v7  ;;  %3069 = vrsqrt.f32 %v3352_v2  ;;  %vm2146_vm11 = vcmp.eq.f32.partialorder %v3352_v2, inf  ;;  %vm2148_vm13 = vcmp.eq.f32.partialorder %v3352_v2, 0.0 }
 0x211   :  { %v1904_v9 = vmul.f32 %v1776_v5, %v1776_v5  ;;  %v1777_v12 = vsub.f32 %v959_v7, %v1504_v6  ;;  %2086 = vadd.xlane.f32.xlu0 %v2085_v8  ;;  %v961_v13 = vpop.f32.mrf.mxu0  ;;  %v3355_v5 = vpop.xlane.xlu0 %1936 }
 0x212   :  { %v1506_v10 = vpop.f32.mrf.mxu1  ;;  %1650 = vst [vmem:[#allocation8 + $0x3a8] sm:$0xff] %v961_v13  ;;  %3071 = vrsqrt.f32 %v3355_v5  ;;  %vm2153_vm12 = vcmp.eq.f32.partialorder %v3355_v5, inf  ;;  %vm2155_vm14 = vcmp.eq.f32.partialorder %v3355_v5, 0.0 }
 0x213   :  { %v1778_v14 = vsub.f32 %v961_v13, %v1506_v10  ;;  %v963_v16 = vpop.f32.mrf.mxu0  ;;  %v2088_v17 = vadd.f32 %v1904_v9, %v1903_v11  ;;  %v1905_v20 = vmul.f32 %v1777_v12, %v1777_v12  ;;  %v3359_v7 = vpop.xlane.xlu1 %1939 }
 0x214   :  { %v1508_v15 = vpop.f32.mrf.mxu1  ;;  %1651 = vst [vmem:[#allocation8 + $0x3b0] sm:$0xff] %v963_v16  ;;  %v3060_v8 = vpop.eup %3059  ;;  %3073 = vrsqrt.f32 %v3359_v7  ;;  %vm2160_vm15 = vcmp.eq.f32.partialorder %v3359_v7, inf }
 0x215   :  { %v1906_v18 = vmul.f32 %v1778_v14, %v1778_v14  ;;  %v1779_v21 = vsub.f32 %v963_v16, %v1508_v15  ;;  %2089 = vadd.xlane.f32.xlu1 %v2088_v17  ;;  %v965_v22 = vpop.f32.mrf.mxu0  ;;  %v3361_v9 = vpop.xlane.xlu0 %1942  ;;  %v2117_v13 = vmul.f32 %v3060_v8, %v3342_v45  ;;  %v2163_v8 = vand.u32 2147483648, %v3359_v7 }
 0x216   :  { %v1510_v19 = vpop.f32.mrf.mxu1  ;;  %1652 = vst [vmem:[#allocation8 + $0x3b8] sm:$0xff] %v965_v22  ;;  %v3062_v10 = vpop.eup %3061  ;;  %3075 = vrsqrt.f32 %v3361_v9 }
 0x217   :  { %v1780_v23 = vsub.f32 %v965_v22, %v1510_v19  ;;  %v969_v25 = vpop.f32.mrf.mxu0  ;;  %v2091_v26 = vadd.f32 %v1906_v18, %v1905_v20  ;;  %v1907_v30 = vmul.f32 %v1779_v21, %v1779_v21  ;;  %v3364_v11 = vpop.xlane.xlu1 %1945  ;;  %v2110_v15 = vmul.f32 %v3062_v10, %v3338_v29 }
 0x218   :  { %v1514_v24 = vpop.f32.mrf.mxu1  ;;  %1653 = vst [vmem:[#allocation8 + $0x3c0] sm:$0xff] %v969_v25  ;;  %v3064_v12 = vpop.eup %3063  ;;  %3077 = vrsqrt.f32 %v3364_v11  ;;  %v2119_v19 = vsel %vm2118_vm0, %v3342_v45, %v2117_v13  ;;  %v2121_v21 = vand.u32 2147483648, %v3342_v45  ;;  %vm2162_vm0 = vcmp.eq.f32.partialorder %v3359_v7, 0.0 }
 0x219   :  { %v1908_v27 = vmul.f32 %v1780_v23, %v1780_v23  ;;  %v1781_v31 = vsub.f32 %v969_v25, %v1514_v24  ;;  %2092 = vadd.xlane.f32.xlu0 %v2091_v26  ;;  %v971_v32 = vpop.f32.mrf.mxu0  ;;  %v3066_v14 = vpop.eup %3065  ;;  %v2124_v17 = vmul.f32 %v3064_v12, %v3340_v42  ;;  %v2112_v24 = vsel %vm2111_vm2, %v3338_v29, %v2110_v15 }
 0x21a   :  { %v1516_v28 = vpop.f32.mrf.mxu1  ;;  %1654 = vst [vmem:[#allocation8 + $0x3c8] sm:$0xff] %v971_v32  ;;  %v3370_v16 = vpop.xlane.xlu0 %1948  ;;  %v2131_v22 = vmul.f32 %v3066_v14, %v3346_v57  ;;  %v2114_v25 = vand.u32 2147483648, %v3338_v29  ;;  %v2142_v29 = vand.u32 2147483648, %v3349_v63  ;;  %vm2167_vm2 = vcmp.eq.f32.partialorder %v3361_v9, inf }
 0x21b   :  { %v1782_v33 = vsub.f32 %v971_v32, %v1516_v28  ;;  %v973_v35 = vpop.f32.mrf.mxu0  ;;  %v2094_v36 = vadd.f32 %v1908_v27, %v1907_v30  ;;  %v1909_v39 = vmul.f32 %v1781_v31, %v1781_v31  ;;  %v3068_v18 = vpop.eup %3067  ;;  %3079 = vrsqrt.f32 %v3370_v16 }
 0x21c   :  { %v1518_v34 = vpop.f32.mrf.mxu1  ;;  %1655 = vst [vmem:[#allocation8 + $0x3d0] sm:$0xff] %v973_v35  ;;  %v3376_v20 = vpop.xlane.xlu1 %1951  ;;  %v2122_v27 = vsel %vm2120_vm4, %v2121_v21, %v2119_v19  ;;  %v2126_v28 = vsel %vm2125_vm5, %v3340_v42, %v2124_v17  ;;  %v2138_v30 = vmul.f32 %v3068_v18, %v3349_v63  ;;  %v2128_v32 = vand.u32 2147483648, %v3340_v42 }
 0x21d   :  { %v1910_v37 = vmul.f32 %v1782_v33, %v1782_v33  ;;  %v1783_v40 = vsub.f32 %v973_v35, %v1518_v34  ;;  %2095 = vadd.xlane.f32.xlu1 %v2094_v36  ;;  %v975_v41 = vpop.f32.mrf.mxu0  ;;  %v3070_v23 = vpop.eup %3069  ;;  %3081 = vrsqrt.f32 %v3376_v20  ;;  %v2115_v33 = vsel %vm2113_vm3, %v2114_v25, %v2112_v24 }
 0x21e   :  { %v1520_v38 = vpop.f32.mrf.mxu1  ;;  %1656 = vst [vmem:[#allocation8 + $0x3d8] sm:$0xff] %v975_v41  ;;  %v3386_v26 = vpop.xlane.xlu0 %1954  ;;  %v2133_v34 = vsel %vm2132_vm7, %v3346_v57, %v2131_v22  ;;  %v2145_v35 = vmul.f32 %v3070_v23, %v3352_v2  ;;  %v2170_v13 = vand.u32 2147483648, %v3361_v9  ;;  %vm2174_vm3 = vcmp.eq.f32.partialorder %v3364_v11, inf }
 0x21f   :  { %v1784_v43 = vsub.f32 %v975_v41, %v1520_v38  ;;  %v979_v46 = vpop.f32.mrf.mxu0  ;;  %v2097_v47 = vadd.f32 %v1910_v37, %v1909_v39  ;;  %v1911_v50 = vmul.f32 %v1783_v40, %v1783_v40  ;;  %v3072_v31 = vpop.eup %3071  ;;  %3083 = vrsqrt.f32 %v3386_v26 }
 0x220   :  { %v1524_v44 = vpop.f32.mrf.mxu1  ;;  %1657 = vst [vmem:[#allocation8 + $0x3e0] sm:$0xff] %v979_v46  ;;  %v3400_v36 = vpop.xlane.xlu1 %1957  ;;  %v2559_v37 = vsel %vm2557_vm1, %v2122_v27, 0.0  ;;  %v2129_v38 = vsel %vm2127_vm6, %v2128_v32, %v2126_v28  ;;  %v2135_v39 = vand.u32 2147483648, %v3346_v57  ;;  %v2140_v41 = vsel %vm2139_vm9, %v3349_v63, %v2138_v30 }
 0x221   :  { %v1912_v48 = vmul.f32 %v1784_v43, %v1784_v43  ;;  %v1785_v51 = vsub.f32 %v979_v46, %v1524_v44  ;;  %2098 = vadd.xlane.f32.xlu0 %v2097_v47  ;;  %v981_v52 = vpop.f32.mrf.mxu0  ;;  %v3074_v40 = vpop.eup %3073  ;;  %v2152_v42 = vmul.f32 %v3072_v31, %v3355_v5  ;;  %v2558_v44 = vsel %vm2557_vm1, %v2115_v33, 0.0 }
 0x222   :  { %v1526_v49 = vpop.f32.mrf.mxu1  ;;  %1658 = vst [vmem:[#allocation8 + $0x3e8] sm:$0xff] %v981_v52  ;;  %v3409_v43 = vpop.xlane.xlu0 %1960  ;;  %v2136_v45 = vsel %vm2134_vm8, %v2135_v39, %v2133_v34  ;;  %3085 = vrsqrt.f32 %v3400_v36  ;;  %v2560_v47 = vadd.f32 %v2559_v37, %v2558_v44  ;;  %v2156_v57 = vand.u32 2147483648, %v3355_v5 }
 0x223   :  { %v1786_v53 = vsub.f32 %v981_v52, %v1526_v49  ;;  %v983_v55 = vpop.f32.mrf.mxu0  ;;  %v2100_v56 = vadd.f32 %v1912_v48, %v1911_v50  ;;  %v1913_v61 = vmul.f32 %v1785_v51, %v1785_v51  ;;  %v3076_v46 = vpop.eup %3075  ;;  %v2561_v48 = vsel %vm2557_vm1, %v2129_v38, 0.0 }
 0x224   :  { %v1528_v54 = vpop.f32.mrf.mxu1  ;;  %1659 = vst [vmem:[#allocation8 + $0x3f0] sm:$0xff] %v983_v55  ;;  %v2147_v49 = vsel %vm2146_vm11, %v3352_v2, %v2145_v35  ;;  %v2149_v50 = vand.u32 2147483648, %v3352_v2  ;;  %v3419_v51 = vpop.xlane.xlu1 %1963  ;;  %v2143_v52 = vsel %vm2141_vm10, %v2142_v29, %v2140_v41  ;;  %3087 = vrsqrt.f32 %v3409_v43 }
 0x225   :  { %v1914_v58 = vmul.f32 %v1786_v53, %v1786_v53  ;;  %v1787_v59 = vsub.f32 %v983_v55, %v1528_v54  ;;  %2101 = vadd.xlane.f32.xlu1 %v2100_v56  ;;  %v985_v62 = vpop.f32.mrf.mxu0  ;;  %v2159_v53 = vmul.f32 %v3074_v40, %v3359_v7  ;;  %v3078_v54 = vpop.eup %3077  ;;  %v2563_v55 = vsel %vm2557_vm1, %v2136_v45, 0.0 }
 0x226   :  { %v1530_v60 = vpop.f32.mrf.mxu1  ;;  %1660 = vst [vmem:[#allocation8 + $0x3f8] sm:$0xff] %v985_v62  ;;  %v2154_v56 = vsel %vm2153_vm12, %v3355_v5, %v2152_v42  ;;  %3089 = vrsqrt.f32 %v3419_v51  ;;  %vm2169_vm4 = vcmp.eq.f32.partialorder %v3361_v9, 0.0  ;;  %v2177_v25 = vand.u32 2147483648, %v3364_v11 }
 0x227   :  { %v1788_v0 = vsub.f32 %v985_v62, %v1530_v60  ;;  %v2103_v1 = vadd.f32 %v1914_v58, %v1913_v61  ;;  %v1915_v3 = vmul.f32 %v1787_v59, %v1787_v59  ;;  %v2562_v58 = vadd.f32 %v2561_v48, %v2560_v47  ;;  %v3430_v61 = vpop.xlane.xlu0 %1966 }
 0x228   :  { %v2150_v59 = vsel %vm2148_vm13, %v2149_v50, %v2147_v49  ;;  %v2166_v60 = vmul.f32 %v3076_v46, %v3361_v9  ;;  %v2565_v62 = vsel %vm2557_vm1, %v2143_v52, 0.0  ;;  %v3080_v63 = vpop.eup %3079  ;;  %v2161_v2 = vsel %vm2160_vm15, %v3359_v7, %v2159_v53 }
 0x229   :  { %v1916_v4 = vmul.f32 %v1788_v0, %v1788_v0  ;;  %2104 = vadd.xlane.f32.xlu0 %v2103_v1  ;;  %v2564_v0 = vadd.f32 %v2563_v55, %v2562_v58  ;;  %v2157_v1 = vsel %vm2155_vm14, %v2156_v57, %v2154_v56  ;;  %3091 = vrsqrt.f32 %v3430_v61 }
 0x22a   :  { %v3082_v5 = vpop.eup %3081  ;;  %v2168_v12 = vsel %vm2167_vm2, %v3361_v9, %v2166_v60  ;;  %v2569_v15 = vsel %vm2557_vm1, %v2157_v1, 0.0  ;;  %v2164_v17 = vsel %vm2162_vm0, %v2163_v8, %v2161_v2  ;;  %v2180_v18 = vmul.f32 %v3080_v63, %v3370_v16 }
 0x22b   :  { %v2106_v6 = vadd.f32 %v1916_v4, %v1915_v3  ;;  %v2173_v3 = vmul.f32 %v3078_v54, %v3364_v11  ;;  %v3438_v4 = vpop.xlane.xlu1 %1969  ;;  %v2566_v10 = vadd.f32 %v2565_v62, %v2564_v0  ;;  %v3447_v14 = vpop.xlane.xlu0 %1972  ;;  %v2171_v24 = vsel %vm2169_vm4, %v2170_v13, %v2168_v12 }
 0x22c   :  { %3093 = vrsqrt.f32 %v3438_v4  ;;  %v3084_v19 = vpop.eup %3083  ;;  %v2187_v27 = vmul.f32 %v3082_v5, %v3376_v20  ;;  %v2571_v28 = vsel %vm2557_vm1, %v2164_v17, 0.0  ;;  %vm2176_vm5 = vcmp.eq.f32.partialorder %v3364_v11, 0.0 }
 0x22d   :  { %2107 = vadd.xlane.f32.xlu1 %v2106_v6  ;;  %v2567_v6 = vsel %vm2557_vm1, %v2150_v59, 0.0  ;;  %v2175_v22 = vsel %vm2174_vm3, %v3364_v11, %v2173_v3  ;;  %3095 = vrsqrt.f32 %v3447_v14  ;;  %vm2181_vm6 = vcmp.eq.f32.partialorder %v3370_v16, inf }
 0x22e   :  { %v2568_v21 = vadd.f32 %v2567_v6, %v2566_v10  ;;  %v2178_v31 = vsel %vm2176_vm5, %v2177_v25, %v2175_v22  ;;  %v2182_v32 = vsel %vm2181_vm6, %v3370_v16, %v2180_v18  ;;  %v2194_v33 = vmul.f32 %v3084_v19, %v3386_v26 }
 0x22f   :  { %v3456_v23 = vpop.xlane.xlu1 %1975  ;;  %v3464_v30 = vpop.xlane.xlu0 %1978  ;;  %v2573_v34 = vsel %vm2557_vm1, %v2171_v24, 0.0  ;;  %vm2183_vm7 = vcmp.eq.f32.partialorder %v3370_v16, 0.0  ;;  %v2184_v35 = vand.u32 2147483648, %v3370_v16  ;;  %vm2188_vm8 = vcmp.eq.f32.partialorder %v3376_v20, inf }
 0x230   :  { %v2570_v7 = vadd.f32 %v2569_v15, %v2568_v21  ;;  %v3086_v9 = vpop.eup %3085  ;;  %3097 = vrsqrt.f32 %v3456_v23  ;;  %v2189_v38 = vsel %vm2188_vm8, %v3376_v20, %v2187_v27  ;;  %v2191_v39 = vand.u32 2147483648, %v3376_v20 }
 0x231   :  { %v3088_v11 = vpop.eup %3087  ;;  %3099 = vrsqrt.f32 %v3464_v30  ;;  %v2575_v41 = vsel %vm2557_vm1, %v2178_v31, 0.0  ;;  %v2185_v29 = vsel %vm2183_vm7, %v2184_v35, %v2182_v32  ;;  %vm2195_vm9 = vcmp.eq.f32.partialorder %v3386_v26, inf }
 0x232   :  { %v2572_v37 = vadd.f32 %v2571_v28, %v2570_v7  ;;  %v2201_v42 = vmul.f32 %v3086_v9, %v3400_v36  ;;  %vm2190_vm10 = vcmp.eq.f32.partialorder %v3376_v20, 0.0  ;;  %v2196_v45 = vsel %vm2195_vm9, %v3386_v26, %v2194_v33 }
 0x233   :  { %v3476_v40 = vpop.xlane.xlu1 %1981  ;;  %v3090_v16 = vpop.eup %3089  ;;  %v2192_v47 = vsel %vm2190_vm10, %v2191_v39, %v2189_v38  ;;  %v2198_v48 = vand.u32 2147483648, %v3386_v26  ;;  %v2208_v49 = vmul.f32 %v3088_v11, %v3409_v43  ;;  %v2577_v52 = vsel %vm2557_vm1, %v2185_v29, 0.0 }
 0x234   :  { %v2574_v44 = vadd.f32 %v2573_v34, %v2572_v37  ;;  %v3483_v46 = vpop.xlane.xlu0 %1984  ;;  %3101 = vrsqrt.f32 %v3476_v40  ;;  %vm2197_vm11 = vcmp.eq.f32.partialorder %v3386_v26, 0.0  ;;  %vm2202_vm12 = vcmp.eq.f32.partialorder %v3400_v36, inf }
 0x235   :  { %v2199_v54 = vsel %vm2197_vm11, %v2198_v48, %v2196_v45  ;;  %v2203_v55 = vsel %vm2202_vm12, %v3400_v36, %v2201_v42  ;;  %v2215_v56 = vmul.f32 %v3090_v16, %v3419_v51  ;;  %3103 = vrsqrt.f32 %v3483_v46 }
 0x236   :  { %v2576_v50 = vadd.f32 %v2575_v41, %v2574_v44  ;;  %v3092_v20 = vpop.eup %3091  ;;  %v2579_v57 = vsel %vm2557_vm1, %v2192_v47, 0.0  ;;  %vm2204_vm13 = vcmp.eq.f32.partialorder %v3400_v36, 0.0  ;;  %v2205_v58 = vand.u32 2147483648, %v3400_v36 }
 0x237   :  { %v3491_v53 = vpop.xlane.xlu1 %1987  ;;  %vm2209_vm14 = vcmp.eq.f32.partialorder %v3409_v43, inf  ;;  %v2212_v62 = vand.u32 2147483648, %v3409_v43  ;;  %v2581_v0 = vsel %vm2557_vm1, %v2199_v54, 0.0  ;;  %vm2216_vm15 = vcmp.eq.f32.partialorder %v3419_v51, inf }
 0x238   :  { %v2578_v59 = vadd.f32 %v2577_v52, %v2576_v50  ;;  %v2210_v60 = vsel %vm2209_vm14, %v3409_v43, %v2208_v49  ;;  %3105 = vrsqrt.f32 %v3491_v53  ;;  %v3503_v63 = vpop.xlane.xlu0 %1990  ;;  %v2206_v1 = vsel %vm2204_vm13, %v2205_v58, %v2203_v55 }
 0x239   :  { %v3094_v26 = vpop.eup %3093  ;;  %v2222_v2 = vmul.f32 %v3092_v20, %v3430_v61  ;;  %vm2211_vm0 = vcmp.eq.f32.partialorder %v3409_v43, 0.0  ;;  %v2217_v6 = vsel %vm2216_vm15, %v3419_v51, %v2215_v56  ;;  %vm2218_vm2 = vcmp.eq.f32.partialorder %v3419_v51, 0.0 }
 0x23a   :  { %v3096_v36 = vpop.eup %3095  ;;  %v2580_v3 = vadd.f32 %v2579_v57, %v2578_v59  ;;  %v2213_v5 = vsel %vm2211_vm0, %v2212_v62, %v2210_v60  ;;  %v2219_v10 = vand.u32 2147483648, %v3419_v51  ;;  %v2229_v12 = vmul.f32 %v3094_v26, %v3438_v4 }
 0x23b   :  { %v3511_v8 = vpop.xlane.xlu1 %1993  ;;  %3107 = vrsqrt.f32 %v3503_v63  ;;  %v2583_v17 = vsel %vm2557_vm1, %v2206_v1, 0.0  ;;  %vm2223_vm3 = vcmp.eq.f32.partialorder %v3430_v61, inf  ;;  %vm2225_vm4 = vcmp.eq.f32.partialorder %v3430_v61, 0.0 }
 0x23c   :  { %v2582_v15 = vadd.f32 %v2581_v0, %v2580_v3  ;;  %v3519_v43 = vpop.xlane.xlu0 %1996  ;;  %v2220_v18 = vsel %vm2218_vm2, %v2219_v10, %v2217_v6  ;;  %v2224_v19 = vsel %vm2223_vm3, %v3430_v61, %v2222_v2  ;;  %v2236_v21 = vmul.f32 %v3096_v36, %v3447_v14 }
 0x23d   :  { %v3098_v13 = vpop.eup %3097  ;;  %3109 = vrsqrt.f32 %v3511_v8  ;;  %v2585_v22 = vsel %vm2557_vm1, %v2213_v5, 0.0  ;;  %v2226_v24 = vand.u32 2147483648, %v3430_v61  ;;  %vm2230_vm5 = vcmp.eq.f32.partialorder %v3438_v4, inf }
 0x23e   :  { %v3100_v51 = vpop.eup %3099  ;;  %vm2232_vm6 = vcmp.eq.f32.partialorder %v3438_v4, 0.0  ;;  %v2584_v25 = vadd.f32 %v2583_v17, %v2582_v15  ;;  %v2231_v27 = vsel %vm2230_vm5, %v3438_v4, %v2229_v12  ;;  %v2243_v7 = vmul.f32 %v3098_v13, %v3456_v23 }
 0x23f   :  { %3111 = vrsqrt.f32 %v3519_v43  ;;  %v3531_v28 = vpop.xlane.xlu1 %1999  ;;  %v2587_v9 = vsel %vm2557_vm1, %v2220_v18, 0.0  ;;  %v2227_v31 = vsel %vm2225_vm4, %v2226_v24, %v2224_v19  ;;  %v2233_v32 = vand.u32 2147483648, %v3438_v4 }
 0x240   :  { %vm2237_vm7 = vcmp.eq.f32.partialorder %v3447_v14, inf  ;;  %v2586_v34 = vadd.f32 %v2585_v22, %v2584_v25  ;;  %vm2239_vm8 = vcmp.eq.f32.partialorder %v3447_v14, 0.0  ;;  %v2250_v11 = vmul.f32 %v3100_v51, %v3464_v30  ;;  %v3541_v37 = vpop.xlane.xlu0 %2002 }
 0x241   :  { %v3102_v33 = vpop.eup %3101  ;;  %v2238_v35 = vsel %vm2237_vm7, %v3447_v14, %v2236_v21  ;;  %v2234_v38 = vsel %vm2232_vm6, %v2233_v32, %v2231_v27  ;;  %v2240_v61 = vand.u32 2147483648, %v3447_v14  ;;  %vm2244_vm9 = vcmp.eq.f32.partialorder %v3456_v23, inf }
 0x242   :  { %3113 = vrsqrt.f32 %v3531_v28  ;;  %v3104_v39 = vpop.eup %3103  ;;  %v2588_v41 = vadd.f32 %v2587_v9, %v2586_v34  ;;  %v2589_v29 = vsel %vm2557_vm1, %v2227_v31, 0.0  ;;  %v2245_v42 = vsel %vm2244_vm9, %v3456_v23, %v2243_v7 }
 0x243   :  { %v2247_v16 = vand.u32 2147483648, %v3456_v23  ;;  %v3551_v44 = vpop.xlane.xlu1 %2005  ;;  %v2241_v45 = vsel %vm2239_vm8, %v2240_v61, %v2238_v35  ;;  %vm2251_vm10 = vcmp.eq.f32.partialorder %v3464_v30, inf  ;;  %v2257_v4 = vmul.f32 %v3102_v33, %v3476_v40 }
 0x244   :  { %3115 = vrsqrt.f32 %v3541_v37  ;;  %v2591_v47 = vsel %vm2557_vm1, %v2234_v38, 0.0  ;;  %vm2246_vm11 = vcmp.eq.f32.partialorder %v3456_v23, 0.0  ;;  %v2252_v48 = vsel %vm2251_vm10, %v3464_v30, %v2250_v11  ;;  %v3562_v54 = vpop.xlane.xlu0 %2008 }
 0x245   :  { %v3106_v14 = vpop.eup %3105  ;;  %v2254_v49 = vand.u32 2147483648, %v3464_v30  ;;  %v2590_v50 = vadd.f32 %v2589_v29, %v2588_v41  ;;  %v2248_v52 = vsel %vm2246_vm11, %v2247_v16, %v2245_v42  ;;  %v2264_v20 = vmul.f32 %v3104_v39, %v3483_v46 }
 0x246   :  { %3117 = vrsqrt.f32 %v3551_v44  ;;  %v2593_v55 = vsel %vm2557_vm1, %v2241_v45, 0.0  ;;  %vm2253_vm12 = vcmp.eq.f32.partialorder %v3464_v30, 0.0  ;;  %vm2258_vm13 = vcmp.eq.f32.partialorder %v3476_v40, inf }
 0x247   :  { %vm2260_vm14 = vcmp.eq.f32.partialorder %v3476_v40, 0.0  ;;  %v2592_v56 = vadd.f32 %v2591_v47, %v2590_v50  ;;  %v2255_v57 = vsel %vm2253_vm12, %v2254_v49, %v2252_v48  ;;  %v2259_v58 = vsel %vm2258_vm13, %v3476_v40, %v2257_v4  ;;  %v3570_v59 = vpop.xlane.xlu1 %2011 }
 0x248   :  { %v3108_v23 = vpop.eup %3107  ;;  %v2271_v26 = vmul.f32 %v3106_v14, %v3491_v53  ;;  %v2595_v60 = vsel %vm2557_vm1, %v2248_v52, 0.0  ;;  %v2261_v62 = vand.u32 2147483648, %v3476_v40  ;;  %vm2265_vm15 = vcmp.eq.f32.partialorder %v3483_v46, inf  ;;  %v3579_v36 = vpop.xlane.xlu0 %2014 }
 0x249   :  { %3119 = vrsqrt.f32 %v3562_v54  ;;  %v2594_v0 = vadd.f32 %v2593_v55, %v2592_v56  ;;  %v2266_v1 = vsel %vm2265_vm15, %v3483_v46, %v2264_v20  ;;  %v2268_v2 = vand.u32 2147483648, %v3483_v46 }
 0x24a   :  { %v3110_v30 = vpop.eup %3109  ;;  %vm2272_vm0 = vcmp.eq.f32.partialorder %v3491_v53, inf  ;;  %v2597_v3 = vsel %vm2557_vm1, %v2255_v57, 0.0  ;;  %v2262_v6 = vsel %vm2260_vm14, %v2261_v62, %v2259_v58  ;;  %v2278_v5 = vmul.f32 %v3108_v23, %v3503_v63 }
 0x24b   :  { %3121 = vrsqrt.f32 %v3570_v59  ;;  %v2596_v12 = vadd.f32 %v2595_v60, %v2594_v0  ;;  %vm2267_vm2 = vcmp.eq.f32.partialorder %v3483_v46, 0.0  ;;  %v2273_v13 = vsel %vm2272_vm0, %v3491_v53, %v2271_v26  ;;  %v3588_v15 = vpop.xlane.xlu1 %2017 }
 0x24c   :  { %v3112_v10 = vpop.eup %3111  ;;  %v2269_v17 = vsel %vm2267_vm2, %v2268_v2, %v2266_v1  ;;  %v2275_v18 = vand.u32 2147483648, %v3491_v53  ;;  %v2285_v19 = vmul.f32 %v3110_v30, %v3511_v8  ;;  %3123 = vrsqrt.f32 %v3579_v36  ;;  %v3596_v51 = vpop.xlane.xlu0 %2020 }
 0x24d   :  { %v2598_v40 = vadd.f32 %v2597_v3, %v2596_v12  ;;  %v2599_v21 = vsel %vm2557_vm1, %v2262_v6, 0.0  ;;  %vm2274_vm3 = vcmp.eq.f32.partialorder %v3491_v53, 0.0  ;;  %vm2279_vm4 = vcmp.eq.f32.partialorder %v3503_v63, inf }
 0x24e   :  { %v2276_v22 = vsel %vm2274_vm3, %v2275_v18, %v2273_v13  ;;  %v2280_v24 = vsel %vm2279_vm4, %v3503_v63, %v2278_v5  ;;  %v2292_v25 = vmul.f32 %v3112_v10, %v3519_v43  ;;  %3125 = vrsqrt.f32 %v3588_v15 }
 0x24f   :  { %v3114_v46 = vpop.eup %3113  ;;  %v2601_v27 = vsel %vm2557_vm1, %v2269_v17, 0.0  ;;  %vm2281_vm5 = vcmp.eq.f32.partialorder %v3503_v63, 0.0  ;;  %v2282_v7 = vand.u32 2147483648, %v3503_v63  ;;  %vm2286_vm6 = vcmp.eq.f32.partialorder %v3511_v8, inf  ;;  %v3608_v33 = vpop.xlane.xlu1 %2023 }
 0x250   :  { %v2600_v9 = vadd.f32 %v2599_v21, %v2598_v40  ;;  %v2287_v31 = vsel %vm2286_vm6, %v3511_v8, %v2285_v19  ;;  %v2289_v32 = vand.u32 2147483648, %v3511_v8  ;;  %3127 = vrsqrt.f32 %v3596_v51  ;;  %v3615_v39 = vpop.xlane.xlu0 %2026 }
 0x251   :  { %v3116_v53 = vpop.eup %3115  ;;  %v2603_v34 = vsel %vm2557_vm1, %v2276_v22, 0.0  ;;  %v2283_v35 = vsel %vm2281_vm5, %v2282_v7, %v2280_v24  ;;  %vm2293_vm7 = vcmp.eq.f32.partialorder %v3519_v43, inf  ;;  %v2299_v11 = vmul.f32 %v3114_v46, %v3531_v28 }
 0x252   :  { %v2602_v38 = vadd.f32 %v2601_v27, %v2600_v9  ;;  %vm2288_vm8 = vcmp.eq.f32.partialorder %v3511_v8, 0.0  ;;  %v2294_v61 = vsel %vm2293_vm7, %v3519_v43, %v2292_v25  ;;  %v2296_v29 = vand.u32 2147483648, %v3519_v43 }
 0x253   :  { %v3118_v63 = vpop.eup %3117  ;;  %v2290_v41 = vsel %vm2288_vm8, %v2289_v32, %v2287_v31  ;;  %v2306_v42 = vmul.f32 %v3116_v53, %v3541_v37  ;;  %3129 = vrsqrt.f32 %v3608_v33  ;;  %v2605_v45 = vsel %vm2557_vm1, %v2283_v35, 0.0  ;;  %v3623_v4 = vpop.xlane.xlu1 %2029 }
 0x254   :  { %v2604_v16 = vadd.f32 %v2603_v34, %v2602_v38  ;;  %vm2295_vm9 = vcmp.eq.f32.partialorder %v3519_v43, 0.0  ;;  %vm2300_vm10 = vcmp.eq.f32.partialorder %v3531_v28, inf  ;;  %v2313_v48 = vmul.f32 %v3118_v63, %v3551_v44  ;;  %v3635_v23 = vpop.xlane.xlu0 %2032 }
 0x255   :  { %v2297_v14 = vsel %vm2295_vm9, %v2296_v29, %v2294_v61  ;;  %v2301_v47 = vsel %vm2300_vm10, %v3531_v28, %v2299_v11  ;;  %3131 = vrsqrt.f32 %v3615_v39  ;;  %v2607_v49 = vsel %vm2557_vm1, %v2290_v41, 0.0 }
 0x256   :  { %v3120_v8 = vpop.eup %3119  ;;  %vm2302_vm11 = vcmp.eq.f32.partialorder %v3531_v28, 0.0  ;;  %v2303_v50 = vand.u32 2147483648, %v3531_v28  ;;  %vm2307_vm12 = vcmp.eq.f32.partialorder %v3541_v37, inf  ;;  %v2606_v52 = vadd.f32 %v2605_v45, %v2604_v16 }
 0x257   :  { %v2308_v20 = vsel %vm2307_vm12, %v3541_v37, %v2306_v42  ;;  %v2310_v55 = vand.u32 2147483648, %v3541_v37  ;;  %3133 = vrsqrt.f32 %v3623_v4  ;;  %v2609_v56 = vsel %vm2557_vm1, %v2297_v14, 0.0  ;;  %v3643_v62 = vpop.xlane.xlu1 %2035 }
 0x258   :  { %v3122_v43 = vpop.eup %3121  ;;  %v2304_v57 = vsel %vm2302_vm11, %v2303_v50, %v2301_v47  ;;  %vm2314_vm13 = vcmp.eq.f32.partialorder %v3551_v44, inf  ;;  %v2320_v58 = vmul.f32 %v3120_v8, %v3562_v54  ;;  %v2608_v26 = vadd.f32 %v2607_v49, %v2606_v52 }
 0x259   :  { %v3124_v28 = vpop.eup %3123  ;;  %vm2309_vm14 = vcmp.eq.f32.partialorder %v3541_v37, 0.0  ;;  %v2315_v60 = vsel %vm2314_vm13, %v3551_v44, %v2313_v48  ;;  %vm2316_vm15 = vcmp.eq.f32.partialorder %v3551_v44, 0.0  ;;  %v2317_v0 = vand.u32 2147483648, %v3551_v44 }
 0x25a   :  { %v2311_v30 = vsel %vm2309_vm14, %v2310_v55, %v2308_v20  ;;  %v2327_v1 = vmul.f32 %v3122_v43, %v3570_v59  ;;  %3135 = vrsqrt.f32 %v3635_v23  ;;  %v2610_v3 = vadd.f32 %v2609_v56, %v2608_v26  ;;  %v3651_v37 = vpop.xlane.xlu0 %2038 }
 0x25b   :  { %v3126_v2 = vpop.eup %3125  ;;  %v2611_v6 = vsel %vm2557_vm1, %v2304_v57, 0.0  ;;  %vm2321_vm0 = vcmp.eq.f32.partialorder %v3562_v54, inf  ;;  %vm2323_vm2 = vcmp.eq.f32.partialorder %v3562_v54, 0.0  ;;  %v2318_v5 = vsel %vm2316_vm15, %v2317_v0, %v2315_v60 }
 0x25c   :  { %v2322_v10 = vsel %vm2321_vm0, %v3562_v54, %v2320_v58  ;;  %v2334_v12 = vmul.f32 %v3124_v28, %v3579_v36  ;;  %3137 = vrsqrt.f32 %v3643_v62  ;;  %v2613_v13 = vsel %vm2557_vm1, %v2311_v30, 0.0 }
 0x25d   :  { %v3128_v44 = vpop.eup %3127  ;;  %v2324_v17 = vand.u32 2147483648, %v3562_v54  ;;  %vm2328_vm3 = vcmp.eq.f32.partialorder %v3570_v59, inf  ;;  %vm2330_vm4 = vcmp.eq.f32.partialorder %v3570_v59, 0.0  ;;  %v2612_v18 = vadd.f32 %v2611_v6, %v2610_v3 }
 0x25e   :  { %v2329_v19 = vsel %vm2328_vm3, %v3570_v59, %v2327_v1  ;;  %v2341_v40 = vmul.f32 %v3126_v2, %v3588_v15  ;;  %3139 = vrsqrt.f32 %v3651_v37  ;;  %v3663_v21 = vpop.xlane.xlu1 %2041  ;;  %v2615_v46 = vsel %vm2557_vm1, %v2318_v5, 0.0 }
 0x25f   :  { %v2325_v22 = vsel %vm2323_vm2, %v2324_v17, %v2322_v10  ;;  %v2331_v24 = vand.u32 2147483648, %v3570_v59  ;;  %vm2335_vm5 = vcmp.eq.f32.partialorder %v3579_v36, inf  ;;  %v2614_v27 = vadd.f32 %v2613_v13, %v2612_v18 }
 0x260   :  { %v3130_v25 = vpop.eup %3129  ;;  %v2336_v7 = vsel %vm2335_vm5, %v3579_v36, %v2334_v12  ;;  %vm2337_vm6 = vcmp.eq.f32.partialorder %v3579_v36, 0.0  ;;  %v2348_v53 = vmul.f32 %v3128_v44, %v3596_v51  ;;  %v2338_v54 = vand.u32 2147483648, %v3579_v36 }
 0x261   :  { %v2332_v31 = vsel %vm2330_vm4, %v2331_v24, %v2329_v19  ;;  %vm2342_vm7 = vcmp.eq.f32.partialorder %v3588_v15, inf  ;;  %3141 = vrsqrt.f32 %v3663_v21  ;;  %v2616_v34 = vadd.f32 %v2615_v46, %v2614_v27 }
 0x262   :  { %v3673_v9 = vpop.xlane.xlu0 %2044  ;;  %v3132_v32 = vpop.eup %3131  ;;  %v2617_v35 = vsel %vm2557_vm1, %v2325_v22, 0.0  ;;  %v2343_v11 = vsel %vm2342_vm7, %v3588_v15, %v2341_v40  ;;  %v2345_v63 = vand.u32 2147483648, %v3588_v15  ;;  %v2339_v61 = vsel %vm2337_vm6, %v2338_v54, %v2336_v7 }
 0x263   :  { %vm2349_vm8 = vcmp.eq.f32.partialorder %v3596_v51, inf  ;;  %v2355_v59 = vmul.f32 %v3130_v25, %v3608_v33  ;;  %3143 = vrsqrt.f32 %v3673_v9  ;;  %v2619_v41 = vsel %vm2557_vm1, %v2332_v31, 0.0 }
 0x264   :  { %v3134_v36 = vpop.eup %3133  ;;  %vm2344_vm9 = vcmp.eq.f32.partialorder %v3588_v15, 0.0  ;;  %v2350_v29 = vsel %vm2349_vm8, %v3596_v51, %v2348_v53  ;;  %v2352_v42 = vand.u32 2147483648, %v3596_v51  ;;  %v2618_v16 = vadd.f32 %v2617_v35, %v2616_v34 }
 0x265   :  { %v2346_v45 = vsel %vm2344_vm9, %v2345_v63, %v2343_v11  ;;  %v2362_v8 = vmul.f32 %v3132_v32, %v3615_v39  ;;  %v2621_v47 = vsel %vm2557_vm1, %v2339_v61, 0.0  ;;  %vm2351_vm10 = vcmp.eq.f32.partialorder %v3596_v51, 0.0 }
 0x266   :  { %v3683_v38 = vpop.xlane.xlu1 %2047  ;;  %vm2356_vm11 = vcmp.eq.f32.partialorder %v3608_v33, inf  ;;  %vm2358_vm12 = vcmp.eq.f32.partialorder %v3608_v33, 0.0  ;;  %v2620_v48 = vadd.f32 %v2619_v41, %v2618_v16  ;;  %v2353_v49 = vsel %vm2351_vm10, %v2352_v42, %v2350_v29 }
 0x267   :  { %3145 = vrsqrt.f32 %v3683_v38  ;;  %v3136_v15 = vpop.eup %3135  ;;  %v2357_v50 = vsel %vm2356_vm11, %v3608_v33, %v2355_v59  ;;  %v2369_v43 = vmul.f32 %v3134_v36, %v3623_v4  ;;  %v2623_v20 = vsel %vm2557_vm1, %v2346_v45, 0.0 }
 0x268   :  { %v2359_v55 = vand.u32 2147483648, %v3608_v33  ;;  %vm2363_vm13 = vcmp.eq.f32.partialorder %v3615_v39, inf  ;;  %v2622_v56 = vadd.f32 %v2621_v47, %v2620_v48  ;;  %v2366_v58 = vand.u32 2147483648, %v3615_v39 }
 0x269   :  { %v3138_v51 = vpop.eup %3137  ;;  %v2364_v57 = vsel %vm2363_vm13, %v3615_v39, %v2362_v8  ;;  %vm2370_vm14 = vcmp.eq.f32.partialorder %v3623_v4, inf  ;;  %v2625_v26 = vsel %vm2557_vm1, %v2353_v49, 0.0  ;;  %v2376_v30 = vmul.f32 %v3136_v15, %v3635_v23 }
 0x26a   :  { %v3694_v14 = vpop.xlane.xlu0 %2050  ;;  %v2360_v60 = vsel %vm2358_vm12, %v2359_v55, %v2357_v50  ;;  %v2624_v1 = vadd.f32 %v2623_v20, %v2622_v56  ;;  %vm2365_vm15 = vcmp.eq.f32.partialorder %v3615_v39, 0.0  ;;  %v2371_v2 = vsel %vm2370_vm14, %v3623_v4, %v2369_v43 }
 0x26b   :  { %3147 = vrsqrt.f32 %v3694_v14  ;;  %v3140_v0 = vpop.eup %3139  ;;  %vm2372_vm0 = vcmp.eq.f32.partialorder %v3623_v4, 0.0  ;;  %v2367_v6 = vsel %vm2365_vm15, %v2366_v58, %v2364_v57  ;;  %v2373_v5 = vand.u32 2147483648, %v3623_v4 }
 0x26c   :  { %v2383_v33 = vmul.f32 %v3138_v51, %v3643_v62  ;;  %v2626_v10 = vadd.f32 %v2625_v26, %v2624_v1  ;;  %v2627_v12 = vsel %vm2557_vm1, %v2360_v60, 0.0  ;;  %vm2377_vm2 = vcmp.eq.f32.partialorder %v3635_v23, inf }
 0x26d   :  { %vm2379_vm3 = vcmp.eq.f32.partialorder %v3635_v23, 0.0  ;;  %v2374_v13 = vsel %vm2372_vm0, %v2373_v5, %v2371_v2  ;;  %v2378_v17 = vsel %vm2377_vm2, %v3635_v23, %v2376_v30  ;;  %v2390_v18 = vmul.f32 %v3140_v0, %v3651_v37 }
 0x26e   :  { %v3702_v52 = vpop.xlane.xlu1 %2053  ;;  %v3142_v44 = vpop.eup %3141  ;;  %v2629_v4 = vsel %vm2557_vm1, %v2367_v6, 0.0  ;;  %v2380_v19 = vand.u32 2147483648, %v3635_v23  ;;  %vm2384_vm4 = vcmp.eq.f32.partialorder %v3643_v62, inf  ;;  %vm2386_vm5 = vcmp.eq.f32.partialorder %v3643_v62, 0.0 }
 0x26f   :  { %3149 = vrsqrt.f32 %v3702_v52  ;;  %v2628_v46 = vadd.f32 %v2627_v12, %v2626_v10  ;;  %v2385_v22 = vsel %vm2384_vm4, %v3643_v62, %v2383_v33  ;;  %v2387_v24 = vand.u32 2147483648, %v3643_v62 }
 0x270   :  { %v3144_v40 = vpop.eup %3143  ;;  %v2631_v27 = vsel %vm2557_vm1, %v2374_v13, 0.0  ;;  %v2381_v7 = vsel %vm2379_vm3, %v2380_v19, %v2378_v17  ;;  %vm2391_vm6 = vcmp.eq.f32.partialorder %v3651_v37, inf  ;;  %v2397_v53 = vmul.f32 %v3142_v44, %v3663_v21 }
 0x271   :  { %v2630_v54 = vadd.f32 %v2629_v4, %v2628_v46  ;;  %v2392_v32 = vsel %vm2391_vm6, %v3651_v37, %v2390_v18  ;;  %vm2393_vm7 = vcmp.eq.f32.partialorder %v3651_v37, 0.0  ;;  %v2394_v34 = vand.u32 2147483648, %v3651_v37 }
 0x272   :  { %v3711_v28 = vpop.xlane.xlu0 %2056  ;;  %v2388_v11 = vsel %vm2386_vm5, %v2387_v24, %v2385_v22  ;;  %vm2398_vm8 = vcmp.eq.f32.partialorder %v3663_v21, inf  ;;  %v2404_v23 = vmul.f32 %v3144_v40, %v3673_v9  ;;  %v2633_v61 = vsel %vm2557_vm1, %v2381_v7, 0.0 }
 0x273   :  { %3151 = vrsqrt.f32 %v3711_v28  ;;  %v2632_v63 = vadd.f32 %v2631_v27, %v2630_v54  ;;  %vm2400_vm9 = vcmp.eq.f32.partialorder %v3663_v21, 0.0  ;;  %v2401_v59 = vand.u32 2147483648, %v3663_v21 }
 0x274   :  { %v3146_v31 = vpop.eup %3145  ;;  %v2395_v41 = vsel %vm2393_vm7, %v2394_v34, %v2392_v32  ;;  %v2399_v62 = vsel %vm2398_vm8, %v3663_v21, %v2397_v53  ;;  %v2635_v42 = vsel %vm2557_vm1, %v2388_v11, 0.0  ;;  %vm2405_vm10 = vcmp.eq.f32.partialorder %v3673_v9, inf }
 0x275   :  { %v2411_v29 = vmul.f32 %v3146_v31, %v3683_v38  ;;  %vm2407_vm11 = vcmp.eq.f32.partialorder %v3673_v9, 0.0  ;;  %v2408_v16 = vand.u32 2147483648, %v3673_v9  ;;  %v2634_v47 = vadd.f32 %v2633_v61, %v2632_v63 }
 0x276   :  { %v3721_v3 = vpop.xlane.xlu1 %2059  ;;  %v2406_v15 = vsel %vm2405_vm10, %v3673_v9, %v2404_v23  ;;  %vm2412_vm12 = vcmp.eq.f32.partialorder %v3683_v38, inf  ;;  %v2637_v48 = vsel %vm2557_vm1, %v2395_v41, 0.0  ;;  %v2402_v49 = vsel %vm2400_vm9, %v2401_v59, %v2399_v62 }
 0x277   :  { %3153 = vrsqrt.f32 %v3721_v3  ;;  %vm2414_vm13 = vcmp.eq.f32.partialorder %v3683_v38, 0.0  ;;  %v2636_v55 = vadd.f32 %v2635_v42, %v2634_v47  ;;  %v2413_v51 = vsel %vm2412_vm12, %v3683_v38, %v2411_v29 }
 0x278   :  { %v3148_v37 = vpop.eup %3147  ;;  %v2415_v56 = vand.u32 2147483648, %v3683_v38  ;;  %v2409_v57 = vsel %vm2407_vm11, %v2408_v16, %v2406_v15  ;;  %vm2419_vm14 = vcmp.eq.f32.partialorder %v3694_v14, inf  ;;  %vm2421_vm15 = vcmp.eq.f32.partialorder %v3694_v14, 0.0 }
 0x279   :  { %v2418_v50 = vmul.f32 %v3148_v37, %v3694_v14  ;;  %v2638_v60 = vadd.f32 %v2637_v48, %v2636_v55  ;;  %v2639_v30 = vsel %vm2557_vm1, %v2402_v49, 0.0  ;;  %v2422_v0 = vand.u32 2147483648, %v3694_v14 }
 0x27a   :  { %v3729_v39 = vpop.xlane.xlu0 %2062  ;;  %v2416_v9 = vsel %vm2414_vm13, %v2415_v56, %v2413_v51  ;;  %vm2426_vm0 = vcmp.eq.f32.partialorder %v3702_v52, inf  ;;  %v2641_v33 = vsel %vm2557_vm1, %v2409_v57, 0.0  ;;  %vm2428_vm2 = vcmp.eq.f32.partialorder %v3702_v52, 0.0 }
 0x27b   :  { %3155 = vrsqrt.f32 %v3729_v39  ;;  %v2420_v1 = vsel %vm2419_vm14, %v3694_v14, %v2418_v50  ;;  %v2429_v10 = vand.u32 2147483648, %v3702_v52  ;;  %v2640_v12 = vadd.f32 %v2639_v30, %v2638_v60 }
 0x27c   :  { %v3150_v8 = vpop.eup %3149  ;;  %vm2433_vm3 = vcmp.eq.f32.partialorder %v3711_v28, inf  ;;  %v2643_v17 = vsel %vm2557_vm1, %v2416_v9, 0.0  ;;  %v2423_v18 = vsel %vm2421_vm15, %v2422_v0, %v2420_v1  ;;  %vm2435_vm4 = vcmp.eq.f32.partialorder %v3711_v28, 0.0 }
 0x27d   :  { %v2425_v21 = vmul.f32 %v3150_v8, %v3702_v52  ;;  %v2642_v19 = vadd.f32 %v2641_v33, %v2640_v12  ;;  %v2436_v46 = vand.u32 2147483648, %v3711_v28  ;;  %vm2440_vm5 = vcmp.eq.f32.partialorder %v3721_v3, inf }
 0x27e   :  { %v3741_v25 = vpop.xlane.xlu1 %2065  ;;  %vm2442_vm6 = vcmp.eq.f32.partialorder %v3721_v3, 0.0  ;;  %v2645_v53 = vsel %vm2557_vm1, %v2423_v18, 0.0  ;;  %v2443_v54 = vand.u32 2147483648, %v3721_v3  ;;  %vm2447_vm7 = vcmp.eq.f32.partialorder %v3729_v39, inf }
 0x27f   :  { %3157 = vrsqrt.f32 %v3741_v25  ;;  %v2427_v38 = vsel %vm2426_vm0, %v3702_v52, %v2425_v21  ;;  %v2644_v7 = vadd.f32 %v2643_v17, %v2642_v19  ;;  %vm2449_vm8 = vcmp.eq.f32.partialorder %v3729_v39, 0.0 }
 0x280   :  { %v3152_v20 = vpop.eup %3151  ;;  %v2430_v24 = vsel %vm2428_vm2, %v2429_v10, %v2427_v38  ;;  %v2450_v63 = vand.u32 2147483648, %v3729_v39  ;;  %vm2454_vm9 = vcmp.eq.f32.partialorder %v3741_v25, inf  ;;  %vm2456_vm10 = vcmp.eq.f32.partialorder %v3741_v25, 0.0 }
 0x281   :  { %v2432_v2 = vmul.f32 %v3152_v20, %v3711_v28  ;;  %v2647_v11 = vsel %vm2557_vm1, %v2430_v24, 0.0  ;;  %v2646_v61 = vadd.f32 %v2645_v53, %v2644_v7  ;;  %v2457_v29 = vand.u32 2147483648, %v3741_v25 }
 0x282   :  { %v3751_v35 = vpop.xlane.xlu0 %2068 }
 0x283   :  { %3159 = vrsqrt.f32 %v3751_v35  ;;  %v2434_v40 = vsel %vm2433_vm3, %v3711_v28, %v2432_v2  ;;  %vm2461_vm11 = vcmp.eq.f32.partialorder %v3751_v35, inf  ;;  %vm2463_vm12 = vcmp.eq.f32.partialorder %v3751_v35, 0.0 }
 0x284   :  { %v3154_v26 = vpop.eup %3153  ;;  %v2437_v52 = vsel %vm2435_vm4, %v2436_v46, %v2434_v40  ;;  %v2464_v15 = vand.u32 2147483648, %v3751_v35 }
 0x285   :  { %v2439_v44 = vmul.f32 %v3154_v26, %v3721_v3  ;;  %v2649_v62 = vsel %vm2557_vm1, %v2437_v52, 0.0 }
 0x286   :  { %v3761_v36 = vpop.xlane.xlu1 %2071 }
 0x287   :  { %3161 = vrsqrt.f32 %v3761_v36  ;;  %v2441_v31 = vsel %vm2440_vm5, %v3721_v3, %v2439_v44  ;;  %vm2468_vm13 = vcmp.eq.f32.partialorder %v3761_v36, inf  ;;  %vm2470_vm14 = vcmp.eq.f32.partialorder %v3761_v36, 0.0 }
 0x288   :  { %v3156_v5 = vpop.eup %3155  ;;  %v2444_v28 = vsel %vm2442_vm6, %v2443_v54, %v2441_v31  ;;  %v2471_v26 = vand.u32 2147483648, %v3761_v36 }
 0x289   :  { %v2446_v22 = vmul.f32 %v3156_v5, %v3729_v39  ;;  %v2651_v47 = vsel %vm2557_vm1, %v2444_v28, 0.0 }
 0x28a   :  { %v3770_v45 = vpop.xlane.xlu0 %2074 }
 0x28b   :  { %3163 = vrsqrt.f32 %v3770_v45  ;;  %v2448_v23 = vsel %vm2447_vm7, %v3729_v39, %v2446_v22  ;;  %v2648_v39 = vadd.f32 %v2647_v11, %v2646_v61  ;;  %vm2475_vm15 = vcmp.eq.f32.partialorder %v3770_v45, inf }
 0x28c   :  { %v3158_v4 = vpop.eup %3157  ;;  %v2451_v42 = vsel %vm2449_vm8, %v2450_v63, %v2448_v23  ;;  %vm2477_vm0 = vcmp.eq.f32.partialorder %v3770_v45, 0.0 }
 0x28d   :  { %v2453_v32 = vmul.f32 %v3158_v4, %v3741_v25  ;;  %v2650_v48 = vadd.f32 %v2649_v62, %v2648_v39  ;;  %v2653_v51 = vsel %vm2557_vm1, %v2451_v42, 0.0 }
 0x28e   :  { %v3780_v43 = vpop.xlane.xlu1 %2077 }
 0x28f   :  { %3165 = vrsqrt.f32 %v3780_v43  ;;  %v2455_v3 = vsel %vm2454_vm9, %v3741_v25, %v2453_v32  ;;  %v2652_v57 = vadd.f32 %v2651_v47, %v2650_v48  ;;  %v2478_v25 = vand.u32 2147483648, %v3770_v45 }
 0x290   :  { %v3160_v27 = vpop.eup %3159  ;;  %v2458_v56 = vsel %vm2456_vm10, %v2457_v29, %v2455_v3  ;;  %vm2482_vm2 = vcmp.eq.f32.partialorder %v3780_v43, inf  ;;  %vm2484_vm3 = vcmp.eq.f32.partialorder %v3780_v43, 0.0  ;;  %v2485_v44 = vand.u32 2147483648, %v3780_v43 }
 0x291   :  { %v2460_v59 = vmul.f32 %v3160_v27, %v3751_v35  ;;  %v2654_v9 = vadd.f32 %v2653_v51, %v2652_v57  ;;  %v2655_v1 = vsel %vm2557_vm1, %v2458_v56, 0.0 }
 0x292   :  { %v3790_v58 = vpop.xlane.xlu0 %2080 }
 0x293   :  { %3167 = vrsqrt.f32 %v3790_v58  ;;  %v2462_v49 = vsel %vm2461_vm11, %v3751_v35, %v2460_v59  ;;  %v2656_v4 = vadd.f32 %v2655_v1, %v2654_v9  ;;  %vm2489_vm4 = vcmp.eq.f32.partialorder %v3790_v58, inf }
 0x294   :  { %v3162_v34 = vpop.eup %3161  ;;  %v2465_v0 = vsel %vm2463_vm12, %v2464_v15, %v2462_v49  ;;  %vm2491_vm5 = vcmp.eq.f32.partialorder %v3790_v58, 0.0  ;;  %v2492_v46 = vand.u32 2147483648, %v3790_v58 }
 0x295   :  { %v2467_v16 = vmul.f32 %v3162_v34, %v3761_v36  ;;  %v2657_v12 = vsel %vm2557_vm1, %v2465_v0, 0.0 }
 0x296   :  { %v3800_v6 = vpop.xlane.xlu1 %2083  ;;  %v2658_v27 = vadd.f32 %v2657_v12, %v2656_v4 }
 0x297   :  { %3169 = vrsqrt.f32 %v3800_v6  ;;  %v2469_v21 = vsel %vm2468_vm13, %v3761_v36, %v2467_v16  ;;  %vm2496_vm6 = vcmp.eq.f32.partialorder %v3800_v6, inf  ;;  %vm2498_vm7 = vcmp.eq.f32.partialorder %v3800_v6, 0.0 }
 0x298   :  { %v3164_v41 = vpop.eup %3163  ;;  %v2472_v35 = vsel %vm2470_vm14, %v2471_v26, %v2469_v21 }
 0x299   :  { %v2474_v50 = vmul.f32 %v3164_v41, %v3770_v45  ;;  %v2659_v19 = vsel %vm2557_vm1, %v2472_v35, 0.0 }
 0x29a   :  { %v3809_v13 = vpop.xlane.xlu0 %2086  ;;  %v2660_v52 = vadd.f32 %v2659_v19, %v2658_v27 }
 0x29b   :  { %3171 = vrsqrt.f32 %v3809_v13  ;;  %v2476_v2 = vsel %vm2475_vm15, %v3770_v45, %v2474_v50  ;;  %vm2503_vm8 = vcmp.eq.f32.partialorder %v3809_v13, inf  ;;  %v2506_v23 = vand.u32 2147483648, %v3809_v13 }
 0x29c   :  { %v3166_v8 = vpop.eup %3165  ;;  %v2479_v36 = vsel %vm2477_vm0, %v2478_v25, %v2476_v2  ;;  %vm2505_vm10 = vcmp.eq.f32.partialorder %v3809_v13, 0.0 }
 0x29d   :  { %v2481_v60 = vmul.f32 %v3166_v8, %v3780_v43  ;;  %v2661_v53 = vsel %vm2557_vm1, %v2479_v36, 0.0 }
 0x29e   :  { %v3824_v14 = vpop.xlane.xlu1 %2089  ;;  %v2662_v28 = vadd.f32 %v2661_v53, %v2660_v52 }
 0x29f   :  { %3173 = vrsqrt.f32 %v3824_v14  ;;  %v2483_v38 = vsel %vm2482_vm2, %v3780_v43, %v2481_v60  ;;  %v2499_v43 = vand.u32 2147483648, %v3800_v6  ;;  %vm2510_vm9 = vcmp.eq.f32.partialorder %v3824_v14, inf }
 0x2a0   :  { %v3168_v55 = vpop.eup %3167  ;;  %v2486_v7 = vsel %vm2484_vm3, %v2485_v44, %v2483_v38  ;;  %v2513_v62 = vand.u32 2147483648, %v3824_v14  ;;  %vm2512_vm12 = vcmp.eq.f32.partialorder %v3824_v14, 0.0 }
 0x2a1   :  { %v2488_v5 = vmul.f32 %v3168_v55, %v3790_v58  ;;  %v2663_v34 = vsel %vm2557_vm1, %v2486_v7, 0.0 }
 0x2a2   :  { %v3842_v37 = vpop.xlane.xlu0 %2092  ;;  %v2664_v29 = vadd.f32 %v2663_v34, %v2662_v28 }
 0x2a3   :  { %3175 = vrsqrt.f32 %v3842_v37  ;;  %v2490_v40 = vsel %vm2489_vm4, %v3790_v58, %v2488_v5  ;;  %vm2517_vm11 = vcmp.eq.f32.partialorder %v3842_v37, inf  ;;  %v2520_v15 = vand.u32 2147483648, %v3842_v37 }
 0x2a4   :  { %v3170_v30 = vpop.eup %3169  ;;  %v2493_v32 = vsel %vm2491_vm5, %v2492_v46, %v2490_v40  ;;  %vm2519_vm14 = vcmp.eq.f32.partialorder %v3842_v37, 0.0 }
 0x2a5   :  { %v2495_v17 = vmul.f32 %v3170_v30, %v3800_v6 }
 0x2a6   :  { %v3857_v20 = vpop.xlane.xlu1 %2095 }
 0x2a7   :  { %3177 = vrsqrt.f32 %v3857_v20  ;;  %v2497_v31 = vsel %vm2496_vm6, %v3800_v6, %v2495_v17  ;;  %v2665_v6 = vsel %vm2557_vm1, %v2493_v32, 0.0  ;;  %vm2524_vm13 = vcmp.eq.f32.partialorder %v3857_v20, inf }
 0x2a8   :  { %v3172_v10 = vpop.eup %3171  ;;  %v2500_v59 = vsel %vm2498_vm7, %v2499_v43, %v2497_v31  ;;  %v2666_v47 = vadd.f32 %v2665_v6, %v2664_v29  ;;  %v2527_v51 = vand.u32 2147483648, %v3857_v20  ;;  %vm2526_vm15 = vcmp.eq.f32.partialorder %v3857_v20, 0.0 }
 0x2a9   :  { %v2502_v22 = vmul.f32 %v3172_v10, %v3809_v13  ;;  %v2667_v16 = vsel %vm2557_vm1, %v2500_v59, 0.0 }
 0x2aa   :  { %v3875_v33 = vpop.xlane.xlu0 %2098  ;;  %v2668_v55 = vadd.f32 %v2667_v16, %v2666_v47 }
 0x2ab   :  { %3179 = vrsqrt.f32 %v3875_v33  ;;  %v2504_v11 = vsel %vm2503_vm8, %v3809_v13, %v2502_v22  ;;  %vm2531_vm0 = vcmp.eq.f32.partialorder %v3875_v33, inf  ;;  %v2534_v21 = vand.u32 2147483648, %v3875_v33 }
 0x2ac   :  { %v3174_v18 = vpop.eup %3173  ;;  %v2507_v39 = vsel %vm2505_vm10, %v2506_v23, %v2504_v11  ;;  %vm2533_vm2 = vcmp.eq.f32.partialorder %v3875_v33, 0.0 }
 0x2ad   :  { %v2509_v54 = vmul.f32 %v3174_v18, %v3824_v14  ;;  %v2669_v49 = vsel %vm2557_vm1, %v2507_v39, 0.0 }
 0x2ae   :  { %v3894_v24 = vpop.xlane.xlu1 %2101 }
 0x2af   :  { %3181 = vrsqrt.f32 %v3894_v24  ;;  %v2511_v41 = vsel %vm2510_vm9, %v3824_v14, %v2509_v54  ;;  %vm2538_vm3 = vcmp.eq.f32.partialorder %v3894_v24, inf  ;;  %vm2540_vm4 = vcmp.eq.f32.partialorder %v3894_v24, 0.0 }
 0x2b0   :  { %v3176_v45 = vpop.eup %3175  ;;  %v2514_v13 = vsel %vm2512_vm12, %v2513_v62, %v2511_v41 }
 0x2b1   :  { %v2516_v63 = vmul.f32 %v3176_v45, %v3842_v37  ;;  %v2671_v57 = vsel %vm2557_vm1, %v2514_v13, 0.0 }
 0x2b2   :  { %v3912_v61 = vpop.xlane.xlu0 %2104 }
 0x2b3   :  { %3183 = vrsqrt.f32 %v3912_v61  ;;  %v2518_v8 = vsel %vm2517_vm11, %v3842_v37, %v2516_v63  ;;  %v2670_v37 = vadd.f32 %v2669_v49, %v2668_v55  ;;  %vm2545_vm5 = vcmp.eq.f32.partialorder %v3912_v61, inf }
 0x2b4   :  { %v3178_v58 = vpop.eup %3177  ;;  %v2521_v56 = vsel %vm2519_vm14, %v2520_v15, %v2518_v8  ;;  %v2548_v17 = vand.u32 2147483648, %v3912_v61  ;;  %vm2547_vm6 = vcmp.eq.f32.partialorder %v3912_v61, 0.0 }
 0x2b5   :  { %v2523_v42 = vmul.f32 %v3178_v58, %v3857_v20  ;;  %v2673_v0 = vsel %vm2557_vm1, %v2521_v56, 0.0  ;;  %v2672_v1 = vadd.f32 %v2671_v57, %v2670_v37 }
 0x2b6   :  { %v2108_v3 = vpop.xlane.xlu1 %2107 }
 0x2b7   :  { %3185 = vrsqrt.f32 %v2108_v3  ;;  %v2525_v50 = vsel %vm2524_vm13, %v3857_v20, %v2523_v42  ;;  %v2541_v20 = vand.u32 2147483648, %v3894_v24  ;;  %v2674_v10 = vadd.f32 %v2673_v0, %v2672_v1 }
 0x2b8   :  { %v3180_v48 = vpop.eup %3179  ;;  %v2528_v26 = vsel %vm2526_vm15, %v2527_v51, %v2525_v50  ;;  %vm2552_vm7 = vcmp.eq.f32.partialorder %v2108_v3, inf  ;;  %v2555_v22 = vand.u32 2147483648, %v2108_v3  ;;  %vm2554_vm8 = vcmp.eq.f32.partialorder %v2108_v3, 0.0 }
 0x2b9   :  { %v2530_v14 = vmul.f32 %v3180_v48, %v3875_v33  ;;  %v2675_v2 = vsel %vm2557_vm1, %v2528_v26, 0.0 }
 0x2ba   :  { %v2676_v44 = vadd.f32 %v2675_v2, %v2674_v10 }
 0x2bb   :  { %v2532_v60 = vsel %vm2531_vm0, %v3875_v33, %v2530_v14 }
 0x2bc   :  { %v3182_v30 = vpop.eup %3181  ;;  %v2535_v9 = vsel %vm2533_vm2, %v2534_v21, %v2532_v60 }
 0x2bd   :  { %v2537_v25 = vmul.f32 %v3182_v30, %v3894_v24  ;;  %v2677_v33 = vsel %vm2557_vm1, %v2535_v9, 0.0 }
 0x2be   :  { %v2678_v19 = vadd.f32 %v2677_v33, %v2676_v44 }
 0x2bf   :  { %v2539_v5 = vsel %vm2538_vm3, %v3894_v24, %v2537_v25 }
 0x2c0   :  { %v3184_v35 = vpop.eup %3183  ;;  %v2542_v12 = vsel %vm2540_vm4, %v2541_v20, %v2539_v5 }
 0x2c1   :  { %v2544_v38 = vmul.f32 %v3184_v35, %v3912_v61  ;;  %v2679_v18 = vsel %vm2557_vm1, %v2542_v12, 0.0 }
 0x2c2   :  { %v2680_v24 = vadd.f32 %v2679_v18, %v2678_v19 }
 0x2c3   :  { %v2546_v36 = vsel %vm2545_vm5, %v3912_v61, %v2544_v38 }
 0x2c4   :  { %v3186_v4 = vpop.eup %3185  ;;  %v2549_v46 = vsel %vm2547_vm6, %v2548_v17, %v2546_v36 }
 0x2c5   :  { %v2551_v40 = vmul.f32 %v3186_v4, %v2108_v3  ;;  %v2681_v27 = vsel %vm2557_vm1, %v2549_v46, 0.0 }
 0x2c6   :  { %v2682_v53 = vadd.f32 %v2681_v27, %v2680_v24 }
 0x2c7   :  { %v2553_v7 = vsel %vm2552_vm7, %v2108_v3, %v2551_v40 }
 0x2c8   :  { %v2556_v45 = vsel %vm2554_vm8, %v2555_v22, %v2553_v7 }
 0x2c9   :  { %v2683_v31 = vsel %vm2557_vm1, %v2556_v45, 0.0 }
 0x2ca   :  { %v2684_v54 = vadd.f32 %v2683_v31, %v2682_v53 }
 0x2cc   :  { %2685 = vadd.xlane.f32.xlu0 %v2684_v54 }
 0x2cd   :  { %3258 = shalt.err (!%p3255_p5)
}
 0x2ce   :  { %s3301_s6 = smov 256   ;;  %s3302_s7 = smov 16  }
 0x2cf   :  { %2707 = dma.vmem_to_hbm [thread:$0]  %s2702_s2, 16384, %s3963_s3, [#allocation4], %s3301_s6, %s3301_s6, %s3302_s7  }
 0x2d0   :  { %s3303_s10 = smov [#allocation9]  }
 0x2d1   :  { %s2714_s11 = sshll.u32 %s3303_s10, 4  ;;  %s2715_s11 = int_to_ptr.vmem [resolvable:$true] %s2714_s11 }
 0x2d2   :  { %s3267_s13 = scalar_lea.vmem %s2715_s11, 128  ;;  %p3272_p7 = scmp.lt.s32.totalorder %s2715_s11, %s2715_s11 }
 0x2d3   :  { %p3268_p6 = scmp.ne.s32.totalorder %s2715_s11, %s3267_s13  ;;  %p3273_p8 = scmp.lt.s32.totalorder %s3267_s13, %s3267_s13 }
 0x2d5   :  { %p3274_p9 = por %p3273_p8, %p3272_p7 }
 0x2d7   :  { %p3275_p10 = pnand %p3274_p9, %p3268_p6 }
 0x355   :  { %v2686_v52 = vpop.xlane.xlu0 %2685 }
 0x356   :  { %v2687_v32 = vrot.slane %v2686_v52, 4 }
 0x358   :  { %v2688_v43 = vadd.f32 %v2687_v32, %v2686_v52 }
 0x35a   :  { %v2689_v34 = vrot.slane %v2688_v43, 2 }
 0x35c   :  { %v2690_v11 = vadd.f32 %v2689_v34, %v2688_v43 }
 0x35e   :  { %v2691_v23 = vrot.slane %v2690_v11, 1 }
 0x360   :  { %v2692_v63 = vadd.f32 %v2691_v23, %v2690_v11 }
 0x362   :  { %2856 = vpush %v2692_v63 }
 0x393   :  { %s2857_s12 = spop %2856 }
 0x394   :  { %v2694_v61 = vstv %s2857_s12 }
 0x395   :  { %2695 = vst [vmem:[#allocation9] sm:$0xff] %v2694_v61 }
 0x396   :  { %3278 = shalt.err (!%p3275_p10)
}
 0x397   :  { %2717 = dma.vmem_to_hbm [thread:$0]  %s2715_s11, 128, %s3964_s4, [#allocation10]  }
 0x398   :  { %3291 = dma.done.wait [#allocation4], 16384  }
 0x399   :  { %3292 = vsyncadd [#allocation4], 4294950912 }
 0x39a   :  { %3293 = dma.done.wait [#allocation10], 128  }
 0x39b   :  { %3294 = vsyncadd [#allocation10], 4294967168 }
 0x39c   :  { %2724 = vsyncpa [#allocation3], 1 }
 0x39d   :  { %2725 = vsyncpa [#allocation6], 1 }
 0x39e   :  { %2726 = vsyncpa [#allocation4], 1 }
 0x39f   :  { %2727 = vsyncpa [#allocation10], 1 }

</bundles_post_ra>
